<compile_context>
chip_gen: v6e
topology: v6e:2x2x1
jax: 0.10.0
libtpu: 0.0.40
codegen_flags: <defaults>
</compile_context>

<pallas_src>
import math
from collections import Counter

import numpy as np
import jax
import jax.numpy as jnp
from jax import lax
from jax.experimental import pallas as pl
from jax.experimental.pallas import tpu as pltpu

# ----------------------------- config ---------------------------------------
HIDDEN = 32          # hidden_num
NUM_HEADS = 4        # head_num
HEAD_DIM = HIDDEN // NUM_HEADS
FFN = 64             # dim_feedforward (small synthetic)
CHAR_LAYERS = 2      # layer_num of CharEncoder
BART_LAYERS = 2      # synthetic stand-in depth
VOCAB = 64
MASK_TOKEN_ID = 3    # tokenizer.mask_token_id (synthetic)
CHAR_MASK_ID = -1    # CharMaskId
MAX_CHAR_NUM = 4     # MaxCharNum
LN_EPS = 1e-5
LOGIT_LANES = 128    # lane-dense padded last dim of the logits output
NEG_BIG = -1e9       # additive attention-mask bias
FILL = -10000.0      # masked_fill value (matches PyTorch)

# stacked-weight dict keys, in kernel-argument order
WKEYS = ("wqkv", "bqkv", "wo", "bo", "w1", "b1", "w2", "b2",
         "g1", "be1", "g2", "be2")


# --------------------------- in-kernel helpers -------------------------------
def _bf16(x):
    return x.astype(jnp.bfloat16)


def _layernorm(x, g, b):
    mu = jnp.mean(x, axis=-1, keepdims=True)
    var = jnp.mean(jnp.square(x - mu), axis=-1, keepdims=True)
    return (x - mu) * lax.rsqrt(var + LN_EPS) * g + b


def _softmax_lastdim(s):
    s = s - jnp.max(s, axis=-1, keepdims=True)
    p = jnp.exp(s)
    return p * pl.reciprocal(jnp.sum(p, axis=-1, keepdims=True), approx=True)


def _encoder_layer(x, attn_bias, wqkv, bqkv, wo, bo,
                   w1, b1, w2, b2, g1, be1, g2, be2):
    """One post-norm Transformer encoder layer on a (T, H) token slab.

    attn_bias broadcasts against the (T, T) score matrix (key-padding bias for
    the BART stand-in, block-diagonal sequence bias for the CharEncoder slab).
    Weight matrices are bf16 (f32 accumulation); biases / LN params are f32.
    """
    T, H = x.shape
    nh, hd = NUM_HEADS, HEAD_DIM
    scale = 1.0 / math.sqrt(hd)

    # fused QKV projection: one lane-dense (T, H) x (H, 3H) matmul
    qkv = jnp.dot(_bf16(x), wqkv, preferred_element_type=jnp.float32) + bqkv
    q = qkv[:, :H]
    k = qkv[:, H:2 * H]
    v = qkv[:, 2 * H:]

    # per-head score / context matmuls (inherently K=hd); heads re-concatenated
    ctxs = []
    for h in range(nh):
        qh = _bf16(q[:, h * hd:(h + 1) * hd])
        kh = _bf16(k[:, h * hd:(h + 1) * hd])
        vh = _bf16(v[:, h * hd:(h + 1) * hd])
        s = lax.dot_general(qh, kh, (((1,), (1,)), ((), ())),
                            preferred_element_type=jnp.float32) * scale
        p = _softmax_lastdim(s + attn_bias)
        ctxs.append(jnp.dot(_bf16(p), vh, preferred_element_type=jnp.float32))
    ctx = jnp.concatenate(ctxs, axis=1)                     # (T, H) head concat

    # ONE output projection (concat(heads) @ Wo)
    attn = jnp.dot(_bf16(ctx), wo, preferred_element_type=jnp.float32) + bo

    # post-norm residual block 1
    y = _layernorm(x + attn, g1, be1)
    # feed-forward (relu), residual, norm 2
    ff = jnp.maximum(jnp.dot(_bf16(y), w1, preferred_element_type=jnp.float32)
                     + b1, 0.0)
    ff = jnp.dot(_bf16(ff), w2, preferred_element_type=jnp.float32) + b2
    return _layernorm(y + ff, g2, be2)


# ------------------------------ Pallas kernels -------------------------------
def _bart_kernel(x_ref, kbias_ref,
                 wqkv, bqkv, wo, bo, w1, b1, w2, b2, g1, be1, g2, be2,
                 o_ref, acc_ref):
    """grid = (batch, layers): one encoder layer per step, weights streamed,
    activations resident in the VMEM scratch accumulator."""
    l = pl.program_id(1)

    @pl.when(l == 0)
    def _():
        acc_ref[...] = x_ref[0]

    h = _encoder_layer(acc_ref[...], kbias_ref[0],
                       wqkv[0], bqkv[0], wo[0], bo[0],
                       w1[0], b1[0], w2[0], b2[0],
                       g1[0], be1[0], g2[0], be2[0])
    acc_ref[...] = h

    @pl.when(l == pl.num_programs(1) - 1)
    def _():
        o_ref[0] = h


def _char_kernel(mens_ref, blkbias_ref, pool_ref, utt_ref, cmask_ref,
                 wqkv, bqkv, wo, bo, w1, b1, w2, b2, g1, be1, g2, be2,
                 o_ref):
    """grid = (batch,): CharEncoder layers on the (C*M, H) slab (block-diag
    attention), one-matmul masked mean pooling, logits + masked_fill, stored
    lane-dense (last dim padded to LOGIT_LANES)."""
    slab = mens_ref[0]                          # (C*M, H)
    bias = blkbias_ref[0]                       # (C*M, C*M) block-diag bias

    n_layers = wqkv.shape[0]                    # small (=CHAR_LAYERS), static
    for l in range(n_layers):
        slab = _encoder_layer(slab, bias,
                              wqkv[l], bqkv[l], wo[l], bo[l],
                              w1[l], b1[l], w2[l], b2[l],
                              g1[l], be1[l], g2[l], be2[l])

    # masked mean pooling: ONE (C, C*M) x (C*M, H) matmul + EUP reciprocal
    pm = pool_ref[0]                                             # (C, C*M)
    sums = jnp.dot(pm, slab, preferred_element_type=jnp.float32)  # (C, H)
    denom = jnp.maximum(jnp.sum(pm, axis=-1, keepdims=True), 1e-9)
    pooled = sums * pl.reciprocal(denom, approx=True)             # (C, H)

    # utterances x characters logits + masked_fill(-10000) where chars_mask==0
    u = utt_ref[0]                                               # (U, H)
    logits = lax.dot_general(_bf16(u), _bf16(pooled), (((1,), (1,)), ((), ())),
                             preferred_element_type=jnp.float32)  # (U, C)
    cm = cmask_ref[0]                                            # (1, C)
    logits = jnp.where(cm == 0.0, jnp.float32(FILL), logits)

    # lane-dense store: pad last dim to LOGIT_LANES (stripped on host)
    U, C = logits.shape
    pad = jnp.full((U, o_ref.shape[2] - C), FILL, jnp.float32)
    o_ref[0] = jnp.concatenate([logits, pad], axis=1)


# ------------------------------ wrappers --------------------------------------
def _nbytes(*arrays):
    return sum(int(a.size) * a.dtype.itemsize for a in arrays)


def bart_encode(x, key_bias, stack):
    """x: (B, S, H) f32, key_bias: (B, 1, S) f32 additive attention bias."""
    B, S, H = x.shape
    L = stack["wqkv"].shape[0]
    F = stack["w1"].shape[-1]

    def wspec(arr):  # stream one layer's weights per grid step
        shp = arr.shape
        return pl.BlockSpec((1, shp[1], shp[2]), lambda b, l: (l, 0, 0))

    in_specs = [
        pl.BlockSpec((1, S, H), lambda b, l: (b, 0, 0)),
        pl.BlockSpec((1, 1, S), lambda b, l: (b, 0, 0)),
    ] + [wspec(stack[k]) for k in WKEYS]

    per_tok = 6 * H * H + 2 * H * H + 4 * H * F + 4 * S * H
    cost = pl.CostEstimate(
        flops=int(B * L * S * per_tok),
        transcendentals=int(B * L * NUM_HEADS * S * S),
        bytes_accessed=int(2 * _nbytes(x) + _nbytes(key_bias)
                           + B * _nbytes(*[stack[k] for k in WKEYS])),
    )
    return pl.pallas_call(
        _bart_kernel,
        grid=(B, L),
        in_specs=in_specs,
        out_specs=pl.BlockSpec((1, S, H), lambda b, l: (b, 0, 0)),
        out_shape=jax.ShapeDtypeStruct((B, S, H), jnp.float32),
        scratch_shapes=[pltpu.VMEM((S, H), jnp.float32)],
        compiler_params=pltpu.CompilerParams(
            dimension_semantics=("parallel", "arbitrary"),
            vmem_limit_bytes=32 * 1024 * 1024),
        cost_estimate=cost,
    )(x, key_bias, *[stack[k] for k in WKEYS])


def char_encode_pool_logits(mens_slab, blk_bias, pool_mat, utters_hidds,
                            chars_masks, stack):
    """mens_slab (B, C*M, H), blk_bias (1, CM, CM), pool_mat (B, C, CM),
    utters_hidds (B, U, H), chars_masks (B, 1, C). Returns (B, U, C) logits."""
    B, CM, H = mens_slab.shape
    U = utters_hidds.shape[1]
    C = pool_mat.shape[1]
    L = stack["wqkv"].shape[0]
    F = stack["w1"].shape[-1]
    CP = LOGIT_LANES

    def wspec(arr):  # all char-layer weights resident (tiny stack)
        return pl.BlockSpec(arr.shape, lambda b: (0, 0, 0))

    in_specs = [
        pl.BlockSpec((1, CM, H), lambda b: (b, 0, 0)),
        pl.BlockSpec((1, CM, CM), lambda b: (0, 0, 0)),
        pl.BlockSpec((1, C, CM), lambda b: (b, 0, 0)),
        pl.BlockSpec((1, U, H), lambda b: (b, 0, 0)),
        pl.BlockSpec((1, 1, C), lambda b: (b, 0, 0)),
    ] + [wspec(stack[k]) for k in WKEYS]

    per_tok = 6 * H * H + 2 * H * H + 4 * H * F + 4 * CM * H
    cost = pl.CostEstimate(
        flops=int(B * L * CM * per_tok + B * (2 * C * CM * H + 2 * U * H * C)),
        transcendentals=int(B * L * NUM_HEADS * CM * CM + B * C),
        bytes_accessed=int(_nbytes(mens_slab, pool_mat, utters_hidds)
                           + B * U * CP * 4
                           + _nbytes(*[stack[k] for k in WKEYS])),
    )
    out = pl.pallas_call(
        _char_kernel,
        grid=(B,),
        in_specs=in_specs,
        out_specs=pl.BlockSpec((1, U, CP), lambda b: (b, 0, 0)),
        out_shape=jax.ShapeDtypeStruct((B, U, CP), jnp.float32),
        compiler_params=pltpu.CompilerParams(
            dimension_semantics=("parallel",),
            vmem_limit_bytes=32 * 1024 * 1024),
        cost_estimate=cost,
    )(mens_slab, blk_bias, pool_mat, utters_hidds, chars_masks,
      *[stack[k] for k in WKEYS])
    return out[:, :, :C]            # strip lane padding on host


# --------------------------- parameters --------------------------------------
def init_encoder_stack(key, n_layers, H, F, nh):
    """Random weights, stored directly in the kernel-friendly layout:
    fused (H, 3H) QKV, (H, H) Wo, FFN (H,F)/(F,H); matrices in bf16."""
    del nh
    kq, ko, k1, k2 = jax.random.split(key, 4)
    s = 0.02

    def nrm(k, shape):
        return s * jax.random.normal(k, shape, jnp.float32)

    return {
        "wqkv": nrm(kq, (n_layers, H, 3 * H)).astype(jnp.bfloat16),
        "bqkv": jnp.zeros((n_layers, 1, 3 * H), jnp.float32),
        "wo": nrm(ko, (n_layers, H, H)).astype(jnp.bfloat16),
        "bo": jnp.zeros((n_layers, 1, H), jnp.float32),
        "w1": nrm(k1, (n_layers, H, F)).astype(jnp.bfloat16),
        "b1": jnp.zeros((n_layers, 1, F), jnp.float32),
        "w2": nrm(k2, (n_layers, F, H)).astype(jnp.bfloat16),
        "b2": jnp.zeros((n_layers, 1, H), jnp.float32),
        "g1": jnp.ones((n_layers, 1, H), jnp.float32),
        "be1": jnp.zeros((n_layers, 1, H), jnp.float32),
        "g2": jnp.ones((n_layers, 1, H), jnp.float32),
        "be2": jnp.zeros((n_layers, 1, H), jnp.float32),
    }


# --------------------------- SpeakerModel forward ----------------------------
def speaker_model_forward(params, input_ids_np, attention_mask_np, token_type_np):
    """input_ids / attention_mask / token_type are HOST numpy arrays; only
    small index / mask tables are built on host -- activations stay on TPU."""
    B, S = input_ids_np.shape
    H = HIDDEN
    C = MAX_CHAR_NUM

    input_ids = jnp.asarray(input_ids_np, dtype=jnp.int32)
    attn_mask = jnp.asarray(attention_mask_np, dtype=jnp.float32)

    # ---- "BART" encoder ------------------------------------------------------
    # TODO(synk): pretrained HF BART encoder + tokenizer replaced by a synthetic
    # embedding table + fused Pallas transformer-encoder layers (no checkpoint).
    x = params["bart_emb"][input_ids] + params["bart_pos"][:S][None, :, :]
    x = x * attn_mask[:, :, None]
    key_bias = ((attn_mask - 1.0) * (-NEG_BIG * -1.0)).reshape(B, 1, S)  # 0 / -1e9
    bart_outs = bart_encode(x, key_bias, params["bart_stack"])           # (B,S,H)

    # ---- host-side index tables (pure numpy on HOST inputs, no device sync) --
    utters_poses = [np.nonzero(input_ids_np[i] == MASK_TOKEN_ID)[0]
                    for i in range(B)]
    utters_nums = [int(len(p)) for p in utters_poses]
    U = max(max(utters_nums), 1)
    utter_idx = np.zeros((B, U), np.int32)
    utters_masks_np = np.zeros((B, U), np.float32)
    for i, pos in enumerate(utters_poses):
        utter_idx[i, :len(pos)] = pos
        utters_masks_np[i, :len(pos)] = 1.0

    men_counts = [Counter([m for m in token_type_np[i].tolist()
                           if m != CHAR_MASK_ID]) for i in range(B)]
    max_mens = [c.most_common(1)[0][1] for c in men_counts if len(c) > 0]
    M = max(max_mens) if len(max_mens) > 0 else 1

    men_idx = np.zeros((B, C, M), np.int32)
    hidds_masks_np = np.zeros((B, C, M), np.float32)
    chars_masks_np = np.zeros((B, C), np.float32)
    for i, mc in enumerate(men_counts):
        sorted_mc = sorted(mc.most_common(), key=lambda t: t[0])
        for ci, (men, freq) in enumerate(sorted_mc):
            pos = np.nonzero(token_type_np[i] == men)[0]
            men_idx[i, ci, :freq] = pos
            hidds_masks_np[i, ci, :freq] = 1.0
            chars_masks_np[i, ci] = 1.0

    # pooling matrix (hidds_mask laid out block-diagonally over the C*M slab)
    pool_np = np.zeros((B, C, C * M), np.float32)
    for ci in range(C):
        pool_np[:, ci, ci * M:(ci + 1) * M] = hidds_masks_np[:, ci, :]
    # block-diagonal additive attention bias (each mention seq attends to itself)
    blk_np = np.full((C * M, C * M), NEG_BIG, np.float32)
    for ci in range(C):
        blk_np[ci * M:(ci + 1) * M, ci * M:(ci + 1) * M] = 0.0

    # ---- vectorized device gathers (one take per table, no per-example loops)
    # TODO(synk): at production sizes fuse these gathers into the char kernel
    # via PrefetchScalarGridSpec scalar-prefetched index tables.
    flat = bart_outs.reshape(B * S, H)
    boff = np.arange(B, dtype=np.int32) * S

    u_idx = jnp.asarray(utter_idx + boff[:, None])                   # (B, U)
    utters_masks = jnp.asarray(utters_masks_np)                      # (B, U)
    utters_hidds = jnp.take(flat, u_idx.reshape(-1), axis=0).reshape(B, U, H)
    utters_hidds = utters_hidds * utters_masks[:, :, None]           # zero pad

    m_idx = jnp.asarray(men_idx + boff[:, None, None])               # (B, C, M)
    hidds_masks = jnp.asarray(hidds_masks_np)                        # (B, C, M)
    mens_hidds = jnp.take(flat, m_idx.reshape(-1), axis=0).reshape(B, C, M, H)
    mens_hidds = mens_hidds * hidds_masks[:, :, :, None]             # zero pad
    mens_slab = mens_hidds.reshape(B, C * M, H)

    blk_bias = jnp.asarray(blk_np.reshape(1, C * M, C * M))
    pool_mat = jnp.asarray(pool_np)                                  # (B, C, CM)
    chars_masks = jnp.asarray(chars_masks_np).reshape(B, 1, C)

    # ---- fused CharEncoder + masked mean pool + logits + chars_mask fill -----
    logits = char_encode_pool_logits(mens_slab, blk_bias, pool_mat,
                                     utters_hidds, chars_masks,
                                     params["char_stack"])           # (B, U, C)

    # TODO(synk): CrossEntropyLoss(ignore_index=CharMaskId) branch not exercised
    # (no 'labels' supplied), loss = None as in the PyTorch else-branch.
    return {"logits": logits, "logits_mask": utters_masks, "loss": None}


# ------------------------------- main ----------------------------------------
if __name__ == "__main__":
    key = jax.random.PRNGKey(0)
    k_emb, k_pos, k_bart, k_char, k_ids = jax.random.split(key, 5)

    params = {
        "bart_emb": 0.02 * jax.random.normal(k_emb, (VOCAB, HIDDEN), jnp.float32),
        "bart_pos": 0.02 * jax.random.normal(k_pos, (64, HIDDEN), jnp.float32),
        "bart_stack": init_encoder_stack(k_bart, BART_LAYERS, HIDDEN, FFN, NUM_HEADS),
        "char_stack": init_encoder_stack(k_char, CHAR_LAYERS, HIDDEN, FFN, NUM_HEADS),
    }

    B, S = 2, 16
    # np.array(...) makes a writable host copy.
    input_ids = np.array(jax.random.randint(k_ids, (B, S), 4, VOCAB),
                         dtype=np.int32)
    # place <mask> tokens (utterances)
    input_ids[0, [2, 7, 12]] = MASK_TOKEN_ID
    input_ids[1, [5, 10]] = MASK_TOKEN_ID

    attention_mask = np.ones((B, S), dtype=np.int32)

    # token_type: mention/character ids, CHAR_MASK_ID elsewhere
    token_type = np.full((B, S), CHAR_MASK_ID, dtype=np.int32)
    token_type[0, [1, 4]] = 0
    token_type[0, [6, 9, 11]] = 1
    token_type[0, [13]] = 2
    token_type[1, [3, 8]] = 0
    token_type[1, [14]] = 1

    out = speaker_model_forward(params, input_ids, attention_mask, token_type)

    jax.block_until_ready(out["logits"])
    jax.block_until_ready(out["logits_mask"])
    assert out["logits"].shape == (B, 3, MAX_CHAR_NUM)
    assert out["logits_mask"].shape == (B, 3)
    assert bool(jnp.all(jnp.isfinite(out["logits"])))
    print("KERNEL_OK")
</pallas_src>

<mosaic_0001>
module attributes {stable_mosaic.version = 11 : i64} {
  func.func @_bart_kernel(%arg0: i32, %arg1: i32, %arg2: memref<1x16x32xf32, #tpu.memory_space<vmem>>, %arg3: memref<1x1x16xf32, #tpu.memory_space<vmem>>, %arg4: memref<1x32x96xbf16, #tpu.memory_space<vmem>>, %arg5: memref<1x1x96xf32, #tpu.memory_space<vmem>>, %arg6: memref<1x32x32xbf16, #tpu.memory_space<vmem>>, %arg7: memref<1x1x32xf32, #tpu.memory_space<vmem>>, %arg8: memref<1x32x64xbf16, #tpu.memory_space<vmem>>, %arg9: memref<1x1x64xf32, #tpu.memory_space<vmem>>, %arg10: memref<1x64x32xbf16, #tpu.memory_space<vmem>>, %arg11: memref<1x1x32xf32, #tpu.memory_space<vmem>>, %arg12: memref<1x1x32xf32, #tpu.memory_space<vmem>>, %arg13: memref<1x1x32xf32, #tpu.memory_space<vmem>>, %arg14: memref<1x1x32xf32, #tpu.memory_space<vmem>>, %arg15: memref<1x1x32xf32, #tpu.memory_space<vmem>>, %arg16: memref<1x16x32xf32, #tpu.memory_space<vmem>>, %arg17: memref<16x32xf32, #tpu.memory_space<vmem>>) attributes {dimension_semantics = [#tpu.dimension_semantics<parallel>, #tpu.dimension_semantics<arbitrary>], iteration_bounds = array<i64: 2, 2>, scalar_prefetch = 0 : i64, scratch_operands = 1 : i64, tpu.core_type = #tpu.core_type<tc>, window_params = [{transform_indices = @transform_0, window_bounds = array<i64: 1, 16, 32>}, {transform_indices = @transform_1, window_bounds = array<i64: 1, 1, 16>}, {transform_indices = @transform_2, window_bounds = array<i64: 1, 32, 96>}, {transform_indices = @transform_3, window_bounds = array<i64: 1, 1, 96>}, {transform_indices = @transform_4, window_bounds = array<i64: 1, 32, 32>}, {transform_indices = @transform_5, window_bounds = array<i64: 1, 1, 32>}, {transform_indices = @transform_6, window_bounds = array<i64: 1, 32, 64>}, {transform_indices = @transform_7, window_bounds = array<i64: 1, 1, 64>}, {transform_indices = @transform_8, window_bounds = array<i64: 1, 64, 32>}, {transform_indices = @transform_9, window_bounds = array<i64: 1, 1, 32>}, {transform_indices = @transform_10, window_bounds = array<i64: 1, 1, 32>}, {transform_indices = @transform_11, window_bounds = array<i64: 1, 1, 32>}, {transform_indices = @transform_12, window_bounds = array<i64: 1, 1, 32>}, {transform_indices = @transform_13, window_bounds = array<i64: 1, 1, 32>}, {transform_indices = @transform_14, window_bounds = array<i64: 1, 16, 32>}]} {
    %c0_i32 = arith.constant 0 : i32
    %0 = arith.cmpi eq, %arg1, %c0_i32 : i32
    %1 = arith.extui %0 : i1 to i32
    %c0_i32_0 = arith.constant 0 : i32
    %2 = arith.cmpi ne, %1, %c0_i32_0 : i32
    scf.if %2 {
      %c0_78 = arith.constant 0 : index
      %c0_79 = arith.constant 0 : index
      %c0_80 = arith.constant 0 : index
      %194 = vector.load %arg2[%c0_78, %c0_79, %c0_80] : memref<1x16x32xf32, #tpu.memory_space<vmem>>, vector<1x16x32xf32>
      %195 = vector.shape_cast %194 : vector<1x16x32xf32> to vector<16x32xf32>
      %c0_81 = arith.constant 0 : index
      %c0_82 = arith.constant 0 : index
      %196 = vector.load %arg17[%c0_81, %c0_82] : memref<16x32xf32, #tpu.memory_space<vmem>>, vector<16x32xf32>
      tpu.vector_store %arg17[%c0_81, %c0_82], %195 {strides = array<i32>} : memref<16x32xf32, #tpu.memory_space<vmem>>, vector<16x32xf32>,
    } else {
    }
    %c0 = arith.constant 0 : index
    %c0_1 = arith.constant 0 : index
    %3 = vector.load %arg17[%c0, %c0_1] : memref<16x32xf32, #tpu.memory_space<vmem>>, vector<16x32xf32>
    %c0_2 = arith.constant 0 : index
    %c0_3 = arith.constant 0 : index
    %c0_4 = arith.constant 0 : index
    %4 = vector.load %arg3[%c0_2, %c0_3, %c0_4] : memref<1x1x16xf32, #tpu.memory_space<vmem>>, vector<1x1x16xf32>
    %5 = vector.shape_cast %4 : vector<1x1x16xf32> to vector<1x16xf32>
    %c0_5 = arith.constant 0 : index
    %c0_6 = arith.constant 0 : index
    %c0_7 = arith.constant 0 : index
    %6 = vector.load %arg4[%c0_5, %c0_6, %c0_7] : memref<1x32x96xbf16, #tpu.memory_space<vmem>>, vector<1x32x96xbf16>
    %7 = vector.shape_cast %6 : vector<1x32x96xbf16> to vector<32x96xbf16>
    %c0_8 = arith.constant 0 : index
    %c0_9 = arith.constant 0 : index
    %c0_10 = arith.constant 0 : index
    %8 = vector.load %arg5[%c0_8, %c0_9, %c0_10] : memref<1x1x96xf32, #tpu.memory_space<vmem>>, vector<1x1x96xf32>
    %9 = vector.shape_cast %8 : vector<1x1x96xf32> to vector<1x96xf32>
    %c0_11 = arith.constant 0 : index
    %c0_12 = arith.constant 0 : index
    %c0_13 = arith.constant 0 : index
    %10 = vector.load %arg6[%c0_11, %c0_12, %c0_13] : memref<1x32x32xbf16, #tpu.memory_space<vmem>>, vector<1x32x32xbf16>
    %11 = vector.shape_cast %10 : vector<1x32x32xbf16> to vector<32x32xbf16>
    %c0_14 = arith.constant 0 : index
    %c0_15 = arith.constant 0 : index
    %c0_16 = arith.constant 0 : index
    %12 = vector.load %arg7[%c0_14, %c0_15, %c0_16] : memref<1x1x32xf32, #tpu.memory_space<vmem>>, vector<1x1x32xf32>
    %13 = vector.shape_cast %12 : vector<1x1x32xf32> to vector<1x32xf32>
    %c0_17 = arith.constant 0 : index
    %c0_18 = arith.constant 0 : index
    %c0_19 = arith.constant 0 : index
    %14 = vector.load %arg8[%c0_17, %c0_18, %c0_19] : memref<1x32x64xbf16, #tpu.memory_space<vmem>>, vector<1x32x64xbf16>
    %15 = vector.shape_cast %14 : vector<1x32x64xbf16> to vector<32x64xbf16>
    %c0_20 = arith.constant 0 : index
    %c0_21 = arith.constant 0 : index
    %c0_22 = arith.constant 0 : index
    %16 = vector.load %arg9[%c0_20, %c0_21, %c0_22] : memref<1x1x64xf32, #tpu.memory_space<vmem>>, vector<1x1x64xf32>
    %17 = vector.shape_cast %16 : vector<1x1x64xf32> to vector<1x64xf32>
    %c0_23 = arith.constant 0 : index
    %c0_24 = arith.constant 0 : index
    %c0_25 = arith.constant 0 : index
    %18 = vector.load %arg10[%c0_23, %c0_24, %c0_25] : memref<1x64x32xbf16, #tpu.memory_space<vmem>>, vector<1x64x32xbf16>
    %19 = vector.shape_cast %18 : vector<1x64x32xbf16> to vector<64x32xbf16>
    %c0_26 = arith.constant 0 : index
    %c0_27 = arith.constant 0 : index
    %c0_28 = arith.constant 0 : index
    %20 = vector.load %arg11[%c0_26, %c0_27, %c0_28] : memref<1x1x32xf32, #tpu.memory_space<vmem>>, vector<1x1x32xf32>
    %21 = vector.shape_cast %20 : vector<1x1x32xf32> to vector<1x32xf32>
    %c0_29 = arith.constant 0 : index
    %c0_30 = arith.constant 0 : index
    %c0_31 = arith.constant 0 : index
    %22 = vector.load %arg12[%c0_29, %c0_30, %c0_31] : memref<1x1x32xf32, #tpu.memory_space<vmem>>, vector<1x1x32xf32>
    %23 = vector.shape_cast %22 : vector<1x1x32xf32> to vector<1x32xf32>
    %c0_32 = arith.constant 0 : index
    %c0_33 = arith.constant 0 : index
    %c0_34 = arith.constant 0 : index
    %24 = vector.load %arg13[%c0_32, %c0_33, %c0_34] : memref<1x1x32xf32, #tpu.memory_space<vmem>>, vector<1x1x32xf32>
    %25 = vector.shape_cast %24 : vector<1x1x32xf32> to vector<1x32xf32>
    %c0_35 = arith.constant 0 : index
    %c0_36 = arith.constant 0 : index
    %c0_37 = arith.constant 0 : index
    %26 = vector.load %arg14[%c0_35, %c0_36, %c0_37] : memref<1x1x32xf32, #tpu.memory_space<vmem>>, vector<1x1x32xf32>
    %27 = vector.shape_cast %26 : vector<1x1x32xf32> to vector<1x32xf32>
    %c0_38 = arith.constant 0 : index
    %c0_39 = arith.constant 0 : index
    %c0_40 = arith.constant 0 : index
    %28 = vector.load %arg15[%c0_38, %c0_39, %c0_40] : memref<1x1x32xf32, #tpu.memory_space<vmem>>, vector<1x1x32xf32>
    %29 = vector.shape_cast %28 : vector<1x1x32xf32> to vector<1x32xf32>
    %30 = arith.truncf %3 : vector<16x32xf32> to vector<16x32xbf16>
    %cst = arith.constant dense<0.000000e+00> : vector<16x96xf32>
    %31 = tpu.matmul %30, %7, %cst {dimension_numbers = #tpu.dot_dimension_numbers<[1], [0], [0], [1], [0, 0, 1, 1], [], []>} : vector<16x32xbf16>, vector<32x96xbf16>, vector<16x96xf32> -> vector<16x96xf32>
    %32 = vector.broadcast %9 : vector<1x96xf32> to vector<16x96xf32>
    %33 = arith.addf %31, %32 : vector<16x96xf32>
    %34 = vector.extract_strided_slice %33 {offsets = [0, 0], sizes = [16, 32], strides = [1, 1]} : vector<16x96xf32> to vector<16x32xf32>
    %35 = vector.extract_strided_slice %33 {offsets = [0, 32], sizes = [16, 32], strides = [1, 1]} : vector<16x96xf32> to vector<16x32xf32>
    %36 = vector.extract_strided_slice %33 {offsets = [0, 64], sizes = [16, 32], strides = [1, 1]} : vector<16x96xf32> to vector<16x32xf32>
    %37 = vector.extract_strided_slice %34 {offsets = [0, 0], sizes = [16, 8], strides = [1, 1]} : vector<16x32xf32> to vector<16x8xf32>
    %38 = arith.truncf %37 : vector<16x8xf32> to vector<16x8xbf16>
    %39 = vector.extract_strided_slice %35 {offsets = [0, 0], sizes = [16, 8], strides = [1, 1]} : vector<16x32xf32> to vector<16x8xf32>
    %40 = arith.truncf %39 : vector<16x8xf32> to vector<16x8xbf16>
    %41 = vector.extract_strided_slice %36 {offsets = [0, 0], sizes = [16, 8], strides = [1, 1]} : vector<16x32xf32> to vector<16x8xf32>
    %42 = arith.truncf %41 : vector<16x8xf32> to vector<16x8xbf16>
    %cst_41 = arith.constant dense<0.000000e+00> : vector<16x16xf32>
    %43 = tpu.matmul %38, %40, %cst_41 {dimension_numbers = #tpu.dot_dimension_numbers<[1], [1], [0], [0], [0, 0, 1, 0], [], []>} : vector<16x8xbf16>, vector<16x8xbf16>, vector<16x16xf32> -> vector<16x16xf32>
    %cst_42 = arith.constant 0.353553385 : f32
    %44 = vector.broadcast %cst_42 : f32 to vector<16x16xf32>
    %45 = arith.mulf %43, %44 : vector<16x16xf32>
    %46 = vector.broadcast %5 : vector<1x16xf32> to vector<16x16xf32>
    %47 = arith.addf %45, %46 : vector<16x16xf32>
    %cst_43 = arith.constant dense<0xFF800000> : vector<16xf32>
    %48 = vector.multi_reduction <maximumf>, %47, %cst_43 [1] : vector<16x16xf32> to vector<16xf32>
    %49 = vector.shape_cast %48 : vector<16xf32> to vector<16x1xf32>
    %50 = vector.broadcast %49 : vector<16x1xf32> to vector<16x16xf32>
    %51 = arith.subf %47, %50 : vector<16x16xf32>
    %52 = math.exp %51 : vector<16x16xf32>
    %cst_44 = arith.constant dense<0.000000e+00> : vector<16xf32>
    %53 = vector.multi_reduction <add>, %52, %cst_44 [1] : vector<16x16xf32> to vector<16xf32>
    %54 = vector.shape_cast %53 : vector<16xf32> to vector<16x1xf32>
    %55 = tpu.reciprocal %54 {approx = true} : vector<16x1xf32> -> vector<16x1xf32>
    %56 = vector.broadcast %55 : vector<16x1xf32> to vector<16x16xf32>
    %57 = arith.mulf %52, %56 : vector<16x16xf32>
    %58 = arith.truncf %57 : vector<16x16xf32> to vector<16x16xbf16>
    %cst_45 = arith.constant dense<0.000000e+00> : vector<16x8xf32>
    %59 = tpu.matmul %58, %42, %cst_45 {dimension_numbers = #tpu.dot_dimension_numbers<[1], [0], [0], [1], [0, 0, 1, 1], [], []>} : vector<16x16xbf16>, vector<16x8xbf16>, vector<16x8xf32> -> vector<16x8xf32>
    %60 = vector.extract_strided_slice %34 {offsets = [0, 8], sizes = [16, 8], strides = [1, 1]} : vector<16x32xf32> to vector<16x8xf32>
    %61 = arith.truncf %60 : vector<16x8xf32> to vector<16x8xbf16>
    %62 = vector.extract_strided_slice %35 {offsets = [0, 8], sizes = [16, 8], strides = [1, 1]} : vector<16x32xf32> to vector<16x8xf32>
    %63 = arith.truncf %62 : vector<16x8xf32> to vector<16x8xbf16>
    %64 = vector.extract_strided_slice %36 {offsets = [0, 8], sizes = [16, 8], strides = [1, 1]} : vector<16x32xf32> to vector<16x8xf32>
    %65 = arith.truncf %64 : vector<16x8xf32> to vector<16x8xbf16>
    %cst_46 = arith.constant dense<0.000000e+00> : vector<16x16xf32>
    %66 = tpu.matmul %61, %63, %cst_46 {dimension_numbers = #tpu.dot_dimension_numbers<[1], [1], [0], [0], [0, 0, 1, 0], [], []>} : vector<16x8xbf16>, vector<16x8xbf16>, vector<16x16xf32> -> vector<16x16xf32>
    %cst_47 = arith.constant 0.353553385 : f32
    %67 = vector.broadcast %cst_47 : f32 to vector<16x16xf32>
    %68 = arith.mulf %66, %67 : vector<16x16xf32>
    %69 = vector.broadcast %5 : vector<1x16xf32> to vector<16x16xf32>
    %70 = arith.addf %68, %69 : vector<16x16xf32>
    %cst_48 = arith.constant dense<0xFF800000> : vector<16xf32>
    %71 = vector.multi_reduction <maximumf>, %70, %cst_48 [1] : vector<16x16xf32> to vector<16xf32>
    %72 = vector.shape_cast %71 : vector<16xf32> to vector<16x1xf32>
    %73 = vector.broadcast %72 : vector<16x1xf32> to vector<16x16xf32>
    %74 = arith.subf %70, %73 : vector<16x16xf32>
    %75 = math.exp %74 : vector<16x16xf32>
    %cst_49 = arith.constant dense<0.000000e+00> : vector<16xf32>
    %76 = vector.multi_reduction <add>, %75, %cst_49 [1] : vector<16x16xf32> to vector<16xf32>
    %77 = vector.shape_cast %76 : vector<16xf32> to vector<16x1xf32>
    %78 = tpu.reciprocal %77 {approx = true} : vector<16x1xf32> -> vector<16x1xf32>
    %79 = vector.broadcast %78 : vector<16x1xf32> to vector<16x16xf32>
    %80 = arith.mulf %75, %79 : vector<16x16xf32>
    %81 = arith.truncf %80 : vector<16x16xf32> to vector<16x16xbf16>
    %cst_50 = arith.constant dense<0.000000e+00> : vector<16x8xf32>
    %82 = tpu.matmul %81, %65, %cst_50 {dimension_numbers = #tpu.dot_dimension_numbers<[1], [0], [0], [1], [0, 0, 1, 1], [], []>} : vector<16x16xbf16>, vector<16x8xbf16>, vector<16x8xf32> -> vector<16x8xf32>
    %83 = vector.extract_strided_slice %34 {offsets = [0, 16], sizes = [16, 8], strides = [1, 1]} : vector<16x32xf32> to vector<16x8xf32>
    %84 = arith.truncf %83 : vector<16x8xf32> to vector<16x8xbf16>
    %85 = vector.extract_strided_slice %35 {offsets = [0, 16], sizes = [16, 8], strides = [1, 1]} : vector<16x32xf32> to vector<16x8xf32>
    %86 = arith.truncf %85 : vector<16x8xf32> to vector<16x8xbf16>
    %87 = vector.extract_strided_slice %36 {offsets = [0, 16], sizes = [16, 8], strides = [1, 1]} : vector<16x32xf32> to vector<16x8xf32>
    %88 = arith.truncf %87 : vector<16x8xf32> to vector<16x8xbf16>
    %cst_51 = arith.constant dense<0.000000e+00> : vector<16x16xf32>
    %89 = tpu.matmul %84, %86, %cst_51 {dimension_numbers = #tpu.dot_dimension_numbers<[1], [1], [0], [0], [0, 0, 1, 0], [], []>} : vector<16x8xbf16>, vector<16x8xbf16>, vector<16x16xf32> -> vector<16x16xf32>
    %cst_52 = arith.constant 0.353553385 : f32
    %90 = vector.broadcast %cst_52 : f32 to vector<16x16xf32>
    %91 = arith.mulf %89, %90 : vector<16x16xf32>
    %92 = vector.broadcast %5 : vector<1x16xf32> to vector<16x16xf32>
    %93 = arith.addf %91, %92 : vector<16x16xf32>
    %cst_53 = arith.constant dense<0xFF800000> : vector<16xf32>
    %94 = vector.multi_reduction <maximumf>, %93, %cst_53 [1] : vector<16x16xf32> to vector<16xf32>
    %95 = vector.shape_cast %94 : vector<16xf32> to vector<16x1xf32>
    %96 = vector.broadcast %95 : vector<16x1xf32> to vector<16x16xf32>
    %97 = arith.subf %93, %96 : vector<16x16xf32>
    %98 = math.exp %97 : vector<16x16xf32>
    %cst_54 = arith.constant dense<0.000000e+00> : vector<16xf32>
    %99 = vector.multi_reduction <add>, %98, %cst_54 [1] : vector<16x16xf32> to vector<16xf32>
    %100 = vector.shape_cast %99 : vector<16xf32> to vector<16x1xf32>
    %101 = tpu.reciprocal %100 {approx = true} : vector<16x1xf32> -> vector<16x1xf32>
    %102 = vector.broadcast %101 : vector<16x1xf32> to vector<16x16xf32>
    %103 = arith.mulf %98, %102 : vector<16x16xf32>
    %104 = arith.truncf %103 : vector<16x16xf32> to vector<16x16xbf16>
    %cst_55 = arith.constant dense<0.000000e+00> : vector<16x8xf32>
    %105 = tpu.matmul %104, %88, %cst_55 {dimension_numbers = #tpu.dot_dimension_numbers<[1], [0], [0], [1], [0, 0, 1, 1], [], []>} : vector<16x16xbf16>, vector<16x8xbf16>, vector<16x8xf32> -> vector<16x8xf32>
    %106 = vector.extract_strided_slice %34 {offsets = [0, 24], sizes = [16, 8], strides = [1, 1]} : vector<16x32xf32> to vector<16x8xf32>
    %107 = arith.truncf %106 : vector<16x8xf32> to vector<16x8xbf16>
    %108 = vector.extract_strided_slice %35 {offsets = [0, 24], sizes = [16, 8], strides = [1, 1]} : vector<16x32xf32> to vector<16x8xf32>
    %109 = arith.truncf %108 : vector<16x8xf32> to vector<16x8xbf16>
    %110 = vector.extract_strided_slice %36 {offsets = [0, 24], sizes = [16, 8], strides = [1, 1]} : vector<16x32xf32> to vector<16x8xf32>
    %111 = arith.truncf %110 : vector<16x8xf32> to vector<16x8xbf16>
    %cst_56 = arith.constant dense<0.000000e+00> : vector<16x16xf32>
    %112 = tpu.matmul %107, %109, %cst_56 {dimension_numbers = #tpu.dot_dimension_numbers<[1], [1], [0], [0], [0, 0, 1, 0], [], []>} : vector<16x8xbf16>, vector<16x8xbf16>, vector<16x16xf32> -> vector<16x16xf32>
    %cst_57 = arith.constant 0.353553385 : f32
    %113 = vector.broadcast %cst_57 : f32 to vector<16x16xf32>
    %114 = arith.mulf %112, %113 : vector<16x16xf32>
    %115 = vector.broadcast %5 : vector<1x16xf32> to vector<16x16xf32>
    %116 = arith.addf %114, %115 : vector<16x16xf32>
    %cst_58 = arith.constant dense<0xFF800000> : vector<16xf32>
    %117 = vector.multi_reduction <maximumf>, %116, %cst_58 [1] : vector<16x16xf32> to vector<16xf32>
    %118 = vector.shape_cast %117 : vector<16xf32> to vector<16x1xf32>
    %119 = vector.broadcast %118 : vector<16x1xf32> to vector<16x16xf32>
    %120 = arith.subf %116, %119 : vector<16x16xf32>
    %121 = math.exp %120 : vector<16x16xf32>
    %cst_59 = arith.constant dense<0.000000e+00> : vector<16xf32>
    %122 = vector.multi_reduction <add>, %121, %cst_59 [1] : vector<16x16xf32> to vector<16xf32>
    %123 = vector.shape_cast %122 : vector<16xf32> to vector<16x1xf32>
    %124 = tpu.reciprocal %123 {approx = true} : vector<16x1xf32> -> vector<16x1xf32>
    %125 = vector.broadcast %124 : vector<16x1xf32> to vector<16x16xf32>
    %126 = arith.mulf %121, %125 : vector<16x16xf32>
    %127 = arith.truncf %126 : vector<16x16xf32> to vector<16x16xbf16>
    %cst_60 = arith.constant dense<0.000000e+00> : vector<16x8xf32>
    %128 = tpu.matmul %127, %111, %cst_60 {dimension_numbers = #tpu.dot_dimension_numbers<[1], [0], [0], [1], [0, 0, 1, 1], [], []>} : vector<16x16xbf16>, vector<16x8xbf16>, vector<16x8xf32> -> vector<16x8xf32>
    %129 = tpu.concatenate %59, %82, %105, %128 in 1 : vector<16x8xf32>, vector<16x8xf32>, vector<16x8xf32>, vector<16x8xf32> -> vector<16x32xf32>
    %130 = arith.truncf %129 : vector<16x32xf32> to vector<16x32xbf16>
    %cst_61 = arith.constant dense<0.000000e+00> : vector<16x32xf32>
    %131 = tpu.matmul %130, %11, %cst_61 {dimension_numbers = #tpu.dot_dimension_numbers<[1], [0], [0], [1], [0, 0, 1, 1], [], []>} : vector<16x32xbf16>, vector<32x32xbf16>, vector<16x32xf32> -> vector<16x32xf32>
    %132 = vector.broadcast %13 : vector<1x32xf32> to vector<16x32xf32>
    %133 = arith.addf %131, %132 : vector<16x32xf32>
    %134 = arith.addf %3, %133 : vector<16x32xf32>
    %cst_62 = arith.constant dense<0.000000e+00> : vector<16xf32>
    %135 = vector.multi_reduction <add>, %134, %cst_62 [1] : vector<16x32xf32> to vector<16xf32>
    %136 = vector.shape_cast %135 : vector<16xf32> to vector<16x1xf32>
    %cst_63 = arith.constant 3.200000e+01 : f32
    %137 = vector.broadcast %cst_63 : f32 to vector<16x1xf32>
    %138 = arith.divf %136, %137 : vector<16x1xf32>
    %139 = vector.broadcast %138 : vector<16x1xf32> to vector<16x32xf32>
    %140 = arith.subf %134, %139 : vector<16x32xf32>
    %141 = arith.mulf %140, %140 : vector<16x32xf32>
    %cst_64 = arith.constant dense<0.000000e+00> : vector<16xf32>
    %142 = vector.multi_reduction <add>, %141, %cst_64 [1] : vector<16x32xf32> to vector<16xf32>
    %143 = vector.shape_cast %142 : vector<16xf32> to vector<16x1xf32>
    %cst_65 = arith.constant 3.200000e+01 : f32
    %144 = vector.broadcast %cst_65 : f32 to vector<16x1xf32>
    %145 = arith.divf %143, %144 : vector<16x1xf32>
    %146 = vector.broadcast %138 : vector<16x1xf32> to vector<16x32xf32>
    %147 = arith.subf %134, %146 : vector<16x32xf32>
    %cst_66 = arith.constant 9.99999974E-6 : f32
    %148 = vector.broadcast %cst_66 : f32 to vector<16x1xf32>
    %149 = arith.addf %145, %148 : vector<16x1xf32>
    %150 = math.rsqrt %149 : vector<16x1xf32>
    %151 = vector.broadcast %150 : vector<16x1xf32> to vector<16x32xf32>
    %152 = arith.mulf %147, %151 : vector<16x32xf32>
    %153 = vector.broadcast %23 : vector<1x32xf32> to vector<16x32xf32>
    %154 = arith.mulf %152, %153 : vector<16x32xf32>
    %155 = vector.broadcast %25 : vector<1x32xf32> to vector<16x32xf32>
    %156 = arith.addf %154, %155 : vector<16x32xf32>
    %157 = arith.truncf %156 : vector<16x32xf32> to vector<16x32xbf16>
    %cst_67 = arith.constant dense<0.000000e+00> : vector<16x64xf32>
    %158 = tpu.matmul %157, %15, %cst_67 {dimension_numbers = #tpu.dot_dimension_numbers<[1], [0], [0], [1], [0, 0, 1, 1], [], []>} : vector<16x32xbf16>, vector<32x64xbf16>, vector<16x64xf32> -> vector<16x64xf32>
    %159 = vector.broadcast %17 : vector<1x64xf32> to vector<16x64xf32>
    %160 = arith.addf %158, %159 : vector<16x64xf32>
    %cst_68 = arith.constant 0.000000e+00 : f32
    %161 = vector.broadcast %cst_68 : f32 to vector<16x64xf32>
    %162 = arith.maximumf %160, %161 : vector<16x64xf32>
    %163 = arith.truncf %162 : vector<16x64xf32> to vector<16x64xbf16>
    %cst_69 = arith.constant dense<0.000000e+00> : vector<16x32xf32>
    %164 = tpu.matmul %163, %19, %cst_69 {dimension_numbers = #tpu.dot_dimension_numbers<[1], [0], [0], [1], [0, 0, 1, 1], [], []>} : vector<16x64xbf16>, vector<64x32xbf16>, vector<16x32xf32> -> vector<16x32xf32>
    %165 = vector.broadcast %21 : vector<1x32xf32> to vector<16x32xf32>
    %166 = arith.addf %164, %165 : vector<16x32xf32>
    %167 = arith.addf %156, %166 : vector<16x32xf32>
    %cst_70 = arith.constant dense<0.000000e+00> : vector<16xf32>
    %168 = vector.multi_reduction <add>, %167, %cst_70 [1] : vector<16x32xf32> to vector<16xf32>
    %169 = vector.shape_cast %168 : vector<16xf32> to vector<16x1xf32>
    %cst_71 = arith.constant 3.200000e+01 : f32
    %170 = vector.broadcast %cst_71 : f32 to vector<16x1xf32>
    %171 = arith.divf %169, %170 : vector<16x1xf32>
    %172 = vector.broadcast %171 : vector<16x1xf32> to vector<16x32xf32>
    %173 = arith.subf %167, %172 : vector<16x32xf32>
    %174 = arith.mulf %173, %173 : vector<16x32xf32>
    %cst_72 = arith.constant dense<0.000000e+00> : vector<16xf32>
    %175 = vector.multi_reduction <add>, %174, %cst_72 [1] : vector<16x32xf32> to vector<16xf32>
    %176 = vector.shape_cast %175 : vector<16xf32> to vector<16x1xf32>
    %cst_73 = arith.constant 3.200000e+01 : f32
    %177 = vector.broadcast %cst_73 : f32 to vector<16x1xf32>
    %178 = arith.divf %176, %177 : vector<16x1xf32>
    %179 = vector.broadcast %171 : vector<16x1xf32> to vector<16x32xf32>
    %180 = arith.subf %167, %179 : vector<16x32xf32>
    %cst_74 = arith.constant 9.99999974E-6 : f32
    %181 = vector.broadcast %cst_74 : f32 to vector<16x1xf32>
    %182 = arith.addf %178, %181 : vector<16x1xf32>
    %183 = math.rsqrt %182 : vector<16x1xf32>
    %184 = vector.broadcast %183 : vector<16x1xf32> to vector<16x32xf32>
    %185 = arith.mulf %180, %184 : vector<16x32xf32>
    %186 = vector.broadcast %27 : vector<1x32xf32> to vector<16x32xf32>
    %187 = arith.mulf %185, %186 : vector<16x32xf32>
    %188 = vector.broadcast %29 : vector<1x32xf32> to vector<16x32xf32>
    %189 = arith.addf %187, %188 : vector<16x32xf32>
    %c0_75 = arith.constant 0 : index
    %c0_76 = arith.constant 0 : index
    %190 = vector.load %arg17[%c0_75, %c0_76] : memref<16x32xf32, #tpu.memory_space<vmem>>, vector<16x32xf32>
    tpu.vector_store %arg17[%c0_75, %c0_76], %189 {strides = array<i32>} : memref<16x32xf32, #tpu.memory_space<vmem>>, vector<16x32xf32>,
    %c1_i32 = arith.constant 1 : i32
    %191 = arith.cmpi eq, %arg1, %c1_i32 : i32
    %192 = arith.extui %191 : i1 to i32
    %c0_i32_77 = arith.constant 0 : i32
    %193 = arith.cmpi ne, %192, %c0_i32_77 : i32
    scf.if %193 {
      %c0_78 = arith.constant 0 : index
      %c0_79 = arith.constant 0 : index
      %c0_80 = arith.constant 0 : index
      %194 = vector.load %arg16[%c0_78, %c0_79, %c0_80] : memref<1x16x32xf32, #tpu.memory_space<vmem>>, vector<1x16x32xf32>
      %195 = vector.shape_cast %194 : vector<1x16x32xf32> to vector<16x32xf32>
      %196 = vector.shape_cast %189 : vector<16x32xf32> to vector<1x16x32xf32>
      tpu.vector_store %arg16[%c0_78, %c0_79, %c0_80], %196 {strides = array<i32>} : memref<1x16x32xf32, #tpu.memory_space<vmem>>, vector<1x16x32xf32>,
    } else {
    }
    return
  }
  func.func @transform_0(%arg0: i32, %arg1: i32) -> (i32, i32, i32) {
    %c0_i32 = arith.constant 0 : i32
    %c0_i32_0 = arith.constant 0 : i32
    %c0_i32_1 = arith.constant 0 : i32
    return %arg0, %c0_i32, %c0_i32_0 : i32, i32, i32
  }
  func.func @transform_1(%arg0: i32, %arg1: i32) -> (i32, i32, i32) {
    %c0_i32 = arith.constant 0 : i32
    %c0_i32_0 = arith.constant 0 : i32
    %c0_i32_1 = arith.constant 0 : i32
    return %arg0, %c0_i32, %c0_i32_0 : i32, i32, i32
  }
  func.func @transform_2(%arg0: i32, %arg1: i32) -> (i32, i32, i32) {
    %c0_i32 = arith.constant 0 : i32
    %c0_i32_0 = arith.constant 0 : i32
    %c0_i32_1 = arith.constant 0 : i32
    return %arg1, %c0_i32, %c0_i32_0 : i32, i32, i32
  }
  func.func @transform_3(%arg0: i32, %arg1: i32) -> (i32, i32, i32) {
    %c0_i32 = arith.constant 0 : i32
    %c0_i32_0 = arith.constant 0 : i32
    %c0_i32_1 = arith.constant 0 : i32
    return %arg1, %c0_i32, %c0_i32_0 : i32, i32, i32
  }
  func.func @transform_4(%arg0: i32, %arg1: i32) -> (i32, i32, i32) {
    %c0_i32 = arith.constant 0 : i32
    %c0_i32_0 = arith.constant 0 : i32
    %c0_i32_1 = arith.constant 0 : i32
    return %arg1, %c0_i32, %c0_i32_0 : i32, i32, i32
  }
  func.func @transform_5(%arg0: i32, %arg1: i32) -> (i32, i32, i32) {
    %c0_i32 = arith.constant 0 : i32
    %c0_i32_0 = arith.constant 0 : i32
    %c0_i32_1 = arith.constant 0 : i32
    return %arg1, %c0_i32, %c0_i32_0 : i32, i32, i32
  }
  func.func @transform_6(%arg0: i32, %arg1: i32) -> (i32, i32, i32) {
    %c0_i32 = arith.constant 0 : i32
    %c0_i32_0 = arith.constant 0 : i32
    %c0_i32_1 = arith.constant 0 : i32
    return %arg1, %c0_i32, %c0_i32_0 : i32, i32, i32
  }
  func.func @transform_7(%arg0: i32, %arg1: i32) -> (i32, i32, i32) {
    %c0_i32 = arith.constant 0 : i32
    %c0_i32_0 = arith.constant 0 : i32
    %c0_i32_1 = arith.constant 0 : i32
    return %arg1, %c0_i32, %c0_i32_0 : i32, i32, i32
  }
  func.func @transform_8(%arg0: i32, %arg1: i32) -> (i32, i32, i32) {
    %c0_i32 = arith.constant 0 : i32
    %c0_i32_0 = arith.constant 0 : i32
    %c0_i32_1 = arith.constant 0 : i32
    return %arg1, %c0_i32, %c0_i32_0 : i32, i32, i32
  }
  func.func @transform_9(%arg0: i32, %arg1: i32) -> (i32, i32, i32) {
    %c0_i32 = arith.constant 0 : i32
    %c0_i32_0 = arith.constant 0 : i32
    %c0_i32_1 = arith.constant 0 : i32
    return %arg1, %c0_i32, %c0_i32_0 : i32, i32, i32
  }
  func.func @transform_10(%arg0: i32, %arg1: i32) -> (i32, i32, i32) {
    %c0_i32 = arith.constant 0 : i32
    %c0_i32_0 = arith.constant 0 : i32
    %c0_i32_1 = arith.constant 0 : i32
    return %arg1, %c0_i32, %c0_i32_0 : i32, i32, i32
  }
  func.func @transform_11(%arg0: i32, %arg1: i32) -> (i32, i32, i32) {
    %c0_i32 = arith.constant 0 : i32
    %c0_i32_0 = arith.constant 0 : i32
    %c0_i32_1 = arith.constant 0 : i32
    return %arg1, %c0_i32, %c0_i32_0 : i32, i32, i32
  }
  func.func @transform_12(%arg0: i32, %arg1: i32) -> (i32, i32, i32) {
    %c0_i32 = arith.constant 0 : i32
    %c0_i32_0 = arith.constant 0 : i32
    %c0_i32_1 = arith.constant 0 : i32
    return %arg1, %c0_i32, %c0_i32_0 : i32, i32, i32
  }
  func.func @transform_13(%arg0: i32, %arg1: i32) -> (i32, i32, i32) {
    %c0_i32 = arith.constant 0 : i32
    %c0_i32_0 = arith.constant 0 : i32
    %c0_i32_1 = arith.constant 0 : i32
    return %arg1, %c0_i32, %c0_i32_0 : i32, i32, i32
  }
  func.func @transform_14(%arg0: i32, %arg1: i32) -> (i32, i32, i32) {
    %c0_i32 = arith.constant 0 : i32
    %c0_i32_0 = arith.constant 0 : i32
    %c0_i32_1 = arith.constant 0 : i32
    return %arg0, %c0_i32, %c0_i32_0 : i32, i32, i32
  }
}

</mosaic_0001>

<bundles_post_ra>
// kernel: tpu_custom_call.1
= control target key start
LH: loop header
LB: loop body
LE: loop exit
PB: predicated region body
PF: predicated region fallthrough
CT: control target
= control target key end

     0   :  { %s3038_s0 = inlined_call_operand.vmem [shape: f32[2,16,32], index: 0, kind: input, shape index: {}]   ;;  %s3039_s1 = inlined_call_operand.hbm [shape: f32[2,1,16], index: 1, kind: input, shape index: {}]   ;;  %s3040_s2 = inlined_call_operand.vmem [shape: bf16[2,32,96], index: 2, kind: input, shape index: {}]   ;;  %s3041_s3 = inlined_call_operand.vmem [shape: f32[2,1,96], index: 3, kind: input, shape index: {}]   ;;  %s3042_s4 = inlined_call_operand.vmem [shape: bf16[2,32,32], index: 4, kind: input, shape index: {}]   ;;  %s3043_s5 = inlined_call_operand.vmem [shape: f32[2,1,32], index: 5, kind: input, shape index: {}]   ;;  %s3044_s6 = inlined_call_operand.hbm [shape: bf16[2,32,64], index: 6, kind: input, shape index: {}]   ;;  %s3045_s7 = inlined_call_operand.vmem [shape: f32[2,1,64], index: 7, kind: input, shape index: {}]   ;;  %s3046_s8 = inlined_call_operand.vmem [shape: bf16[2,64,32], index: 8, kind: input, shape index: {}]   ;;  %s3047_s9 = inlined_call_operand.vmem [shape: f32[2,1,32], index: 9, kind: input, shape index: {}]   ;;  %s3048_s10 = inlined_call_operand.vmem [shape: f32[2,1,32], index: 10, kind: input, shape index: {}]   ;;  %s3049_s11 = inlined_call_operand.vmem [shape: f32[2,1,32], index: 11, kind: input, shape index: {}]   ;;  %s3050_s12 = inlined_call_operand.vmem [shape: f32[2,1,32], index: 12, kind: input, shape index: {}]   ;;  %s3051_s13 = inlined_call_operand.vmem [shape: f32[2,1,32], index: 13, kind: input, shape index: {}]   ;;  %s3052_s14 = inlined_call_operand.hbm [shape: f32[2,16,32], index: 14, kind: output, shape index: {}]  }
   0x1   :  { %3071 = sst [smem:[#allocation27_spill]] %s3038_s0 }
   0x2   :  { %3072 = sst [smem:[#allocation28_spill]] %s3039_s1 }
   0x3   :  { %3073 = sst [smem:[#allocation29_spill]] %s3040_s2 }
   0x4   :  { %3074 = sst [smem:[#allocation30_spill]] %s3042_s4 }
   0x5   :  { %3075 = sst [smem:[#allocation31_spill]] %s3043_s5 }
   0x6   :  { %3076 = sst [smem:[#allocation32_spill]] %s3044_s6 }
   0x7   :  { %3077 = sst [smem:[#allocation33_spill]] %s3045_s7 }
   0x8   :  { %3078 = sst [smem:[#allocation34_spill]] %s3046_s8 }
   0x9   :  { %3079 = sst [smem:[#allocation35_spill]] %s3047_s9 }
   0xa   :  { %3080 = sst [smem:[#allocation36_spill]] %s3048_s10 }
   0xb   :  { %3081 = sst [smem:[#allocation37_spill]] %s3049_s11 }
   0xc   :  { %3082 = sst [smem:[#allocation38_spill]] %s3050_s12 }
   0xd   :  { %3083 = sst [smem:[#allocation39_spill]] %s3051_s13 }
   0xe   :  { %3084 = sst [smem:[#allocation40_spill]] %s3052_s14 }
   0xf   :  { %19 = vsyncpa [#allocation4], 0 }
  0x10   :  { %21 = vsyncpa [#allocation4 + $0x1], 0 }
  0x11   :  { %22 = vsyncpa [#allocation7], 0 }
  0x12   :  { %24 = vsyncpa [#allocation7 + $0x1], 0 }
  0x13   :  { %25 = vsyncpa [#allocation5], 0 }
  0x14   :  { %27 = vsyncpa [#allocation5 + $0x1], 0  ;;  %s2554_s29 = smov 0   ;;  %s2556_s30 = smov 0  }
  0x15   :  { %s2558_s15 = smov 0   ;;  %s2560_s16 = smov 0  }
  0x16   :  { %s2562_s17 = smov 0   ;;  %s2564_s18 = smov 0  }
  0x17   :  { %s2566_s19 = smov 0   ;;  %s2568_s20 = smov 0  }
  0x18   :  { %s2570_s21 = smov 0   ;;  %s2572_s22 = smov 0  }
  0x19   :  { %s2574_s23 = smov 0  }
  0x1a LB: > { %3085 = sst [smem:[#allocation12_spill]] %s2419_s30  ;;  %s1907_s24 = sadd.s32 4294967295, %s2455_s23   ;;  %s2455_s23 = sphi %s2574_s23, %s33_s23   ;;  %s2451_s22 = sphi %s2572_s22, %s3156_s22   ;;  %s2447_s21 = sphi %s2570_s21, %s3155_s21   ;;  %s2443_s20 = sphi %s2568_s20, %s3154_s20   ;;  %s2439_s19 = sphi %s2566_s19, %s3153_s19   ;;  %s2435_s18 = sphi %s2564_s18, %s3152_s18   ;;  %s2431_s17 = sphi %s2562_s17, %s3151_s17   ;;  %s2427_s16 = sphi %s2560_s16, %s3150_s16   ;;  %s2423_s15 = sphi %s2558_s15, %s3149_s15   ;;  %s2419_s30 = sphi %s2556_s30, %s3148_s30   ;;  %s2415_s29 = sphi %s2554_s29, %s3147_s29  }
  0x1b   : > { %3086 = sst [smem:[#allocation13_spill]] %s2423_s15  ;;  %s1908_s25 = sadd.s32 4294967294, %s2455_s23  }
  0x1c   : > { %3087 = sst [smem:[#allocation14_spill]] %s2427_s16  ;;  %p85_p0 = scmp.ne.s32.totalorder %s2435_s18, %s2431_s17 }
  0x1d   : > { %3088 = sst [smem:[#allocation15_spill]] %s2431_s17  ;;  %p86_p1 = scmp.eq.s32.totalorder %s2455_s23, 0 }
  0x1e   : > { %3089 = sst [smem:[#allocation16_spill]] %s2435_s18  ;;  %p91_p2 = scmp.ne.s32.totalorder %s2431_s17, %s2427_s16 }
  0x1f   : > { %3090 = sst [smem:[#allocation17_spill]] %s2443_s20  ;;  %p92_p3 = scmp.eq.s32.totalorder %s1907_s24, 0 }
  0x20   : > { %3091 = sst [smem:[#allocation18_spill]] %s2447_s21  ;;  %p2616_p4 = por %p86_p1, %p85_p0 }
  0x21   : > { %3092 = sst [smem:[#allocation19_spill]] %s2451_s22  ;;  %p215_p5 = scmp.ne.s32.totalorder %s2423_s15, %s2419_s30 }
  0x22   : > { %3093 = sst [smem:[#allocation20_spill]] %s2455_s23  ;;  %p2622_p6 = por %p92_p3, %p91_p2 }
  0x23   : > { %p221_p7 = scmp.ne.s32.totalorder %s2419_s30, %s2415_s29  ;;  %p2627_p8 = por %p215_p5, %p86_p1 }
  0x24   : > { %p427_p9 = scmp.eq.s32.totalorder %s1907_s24, 3  ;;  %p433_p11 = scmp.eq.s32.totalorder %s1908_s25, 3 }
  0x25   : > { %p2631_p10 = por %p221_p7, %p92_p3  ;;  %p2101_p1 = scmp.lt.s32.totalorder %s2455_s23, 4 }
  0x26   : > { %p2635_p12 = por %p427_p9, %p85_p0  ;;  %p2639_p13 = por %p433_p11, %p91_p2 }
  0x27   : > { %s3097_s26 = scalar_select %p2631_p10, 1, 0 }
  0x28   : > { %s3098_s16 = scalar_select %p2635_p12, 1, 0 }
  0x29   : > { %s3100_s13 = scalar_select %p2639_p13, 1, 0 }
  0x2a   : > { %3099 = sst [smem:[#allocation21_spill]] %s3098_s16  ;;  %s461_s29 = sand.u32 1, %s2435_s18  }
  0x2b   : > { %3101 = sst [smem:[#allocation22_spill]] %s3100_s13  ;;  %s1911_s12 = sshll.u32 %s2451_s22, 4 }
  0x2c   : > { %s3102_s1 = sld [smem:[#allocation28_spill]]  ;;  %s464_s9 = scalar_lea.vmem [#allocation3], %s461_s29 }
  0x2d   : > { %s471_s8 = sshll.u32 %s464_s9, 4  ;;  %p2651_p3 = pnand %p2101_p1, %p2616_p4  ;;  %s472_s8 = int_to_ptr.vmem [resolvable:$true] %s471_s8 }
  0x2e   : > { %p2657_p0 = pnand %p2101_p1, %p2627_p8  ;;  %p1915_p2 = scmp.ge.s32.totalorder %s2455_s23, 1 }
  0x2f   : > { %p569_p5 = scmp.lt.s32.totalorder %s2455_s23, 5  ;;  %s462_s13 = scalar_lea.sflag [#allocation4], %s461_s29 }
  0x30   : > { %p2277_p7 = pneg %p2651_p3  ;;  %s2288_s10 = scalar_lea.vmem %s472_s8, 16 }
  0x31   : > { %p2289_p9 = scmp.ne.s32.totalorder %s472_s8, %s2288_s10  ;;  %s2457_s9 = smov [#allocation3]  }
  0x32   : > { %s469_s24 = scalar_lea.hbm %s3102_s1, %s1911_s12  ;;  %s2293_s11 = sshll.u32 %s2457_s9, 4  ;;  %s2294_s11 = int_to_ptr.vmem [resolvable:$false] %s2293_s11 }
  0x33   : > { %p2291_p11 = pnand %p2289_p9, %p2277_p7  ;;  %s2295_s12 = scalar_lea.vmem %s2294_s11, 32 }
  0x34   : > { %p2296_p4 = scmp.lt.s32.totalorder %s472_s8, %s2294_s11  ;;  %p2297_p12 = scmp.lt.s32.totalorder %s2295_s12, %s2288_s10 }
  0x35   : > { %p2292_p13 = pneg %p2291_p11 }
  0x36   : > { %p2298_p10 = por %p2297_p12, %p2296_p4 }
  0x38   : > { %p2299_p8 = pnand %p2298_p10, %p2292_p13 }
  0x3a   : > { %2302 = shalt.err (!%p2299_p8)
}
  0x3b   : > { %2093 = dma.hbm_to_vmem [thread:$0]  (!%p2651_p3), %s469_s24, 16, %s472_s8, %s462_s13  }
  0x3c   : > { %p2671_p1 = pnand %p1915_p2, %p569_p5  ;;  %s208_s28 = sadd.s32 1, %s2423_s15 }
  0x3d   : > { %s506_s29 = sand.u32 1, %s2423_s15   ;;  %s42_s25 = sadd.s32 1, %s2447_s21 }
  0x3e   : > { %p43_p10 = scmp.ge.s32.totalorder %s42_s25, 2  ;;  %s1912_s10 = sshll.u32 %s506_s29, 4 }
  0x3f   : > { %s1964_s9 = sshll.u32 %s2447_s21, 8  ;;  %s3107_s11 = sadd.s32 1, %s2451_s22 }
  0x40   : > { %s3158_s25 = smov (%p43_p10, %s42_s25), 0  ;;  %s3160_s11 = smov (!%p43_p10, %s3107_s11), %s2451_s22 }
  0x41   : > { %3106 = sst [smem:[#allocation23_spill]] %s3158_s25  ;;  %s205_s8 = ssub.s32 %s2447_s21, %s3158_s25 }
  0x42   : > { %s3108_s6 = sld [smem:[#allocation32_spill]]  ;;  %p47_p12 = scmp.ge.s32.totalorder %s3160_s11, 2 }
  0x43   : > { %p206_p13 = scmp.eq.s32.totalorder %s205_s8, 0  ;;  %s510_s1 = scalar_lea.vmem [#allocation6], %s1912_s10 }
  0x44   : > { %s517_s23 = sshll.u32 %s510_s1, 4  ;;  %s3162_s11 = smov (%p47_p12, %s3160_s11), 0  ;;  %s518_s23 = int_to_ptr.vmem [resolvable:$true] %s517_s23 }
  0x45   : > { %3109 = sst [smem:[#allocation24_spill]] %s3162_s11  ;;  %s75_s5 = ssub.s32 %s2451_s22, %s3162_s11 }
  0x46   : > { %s2694_s7 = scalar_select %p206_p13, %s2423_s15, %s208_s28  }
  0x47   : > { %p2698_p3 = scmp.eq.s32.totalorder %s75_s5, 0  ;;  %s507_s25 = scalar_lea.sflag [#allocation7], %s506_s29 }
  0x48   : > { %s2689_s12 = scalar_lea.hbm %s3108_s6, %s1964_s9  ;;  %3110 = sst [smem:[#allocation25_spill]] %s2694_s7 }
  0x49   : > { %p2305_p2 = pneg %p2657_p0  ;;  %s2316_s9 = scalar_lea.vmem %s518_s23, 256 }
  0x4a   : > { %p2317_p5 = scmp.ne.s32.totalorder %s518_s23, %s2316_s9  ;;  %s2458_s10 = smov [#allocation6]  }
  0x4b   : > { %s2321_s1 = sshll.u32 %s2458_s10, 4  ;;  %s2322_s1 = int_to_ptr.vmem [resolvable:$false] %s2321_s1 }
  0x4c   : > { %p2319_p7 = pnand %p2317_p5, %p2305_p2  ;;  %s2323_s8 = scalar_lea.vmem %s2322_s1, 512 }
  0x4d   : > { %p2324_p11 = scmp.lt.s32.totalorder %s518_s23, %s2322_s1  ;;  %p2325_p4 = scmp.lt.s32.totalorder %s2323_s8, %s2316_s9 }
  0x4e   : > { %p2320_p9 = pneg %p2319_p7 }
  0x4f   : > { %p2326_p8 = por %p2325_p4, %p2324_p11 }
  0x51   : > { %p2327_p10 = pnand %p2326_p8, %p2320_p9 }
  0x53   : > { %2330 = shalt.err (!%p2327_p10)
}
  0x54   : > { %s2459_s5 = smov 64   ;;  %s2460_s28 = smov 4  }
  0x55   : > { %2096 = dma.hbm_to_vmem [thread:$0]  (!%p2657_p0), %s2689_s12, 256, %s518_s23, %s507_s25, %s2459_s5, %s2459_s5, %s2460_s28  }
  0x56   : > { %s3112_s29 = sadd.s32 1, %s2435_s18  ;;  %573 = sbr.rel (%p2671_p1) target bundleno = 2609 (0xa31), region = 76 }
  0x57   : > { %s2712_s13 = scalar_select %p2698_p3, %s2435_s18, %s3112_s29  }
  0x58   : > { %s2717_s24 = sand.u32 (!%p2671_p1), 1, %s2431_s17  }
  0x59   : > { %3113 = sst [smem:[#allocation26_spill]] %s2712_s13  ;;  %s576_s9 = scalar_lea.sflag (!%p2671_p1), [#allocation4], %s2717_s24 }
  0x5b   : > { %2402 = dma.done.wait (%p2622_p6), %s576_s9, 16  }
  0x5c   : > { %2404 = vsyncadd (%p2622_p6), %s576_s9, 4294967280  ;;  %s583_s4 = sand.u32 1, %s2419_s30   ;;  %p3114_p0 = scmp.ne.s32.totalorder %s3097_s26, 0 }
  0x5d   : > { %s2726_s16 = sshll.u32 %s583_s4, 4  ;;  %s584_s23 = scalar_lea.sflag [#allocation7], %s583_s4 }
  0x5e   : > { %2406 = dma.done.wait (%p3114_p0), %s584_s23, 256  }
  0x5f   : > { %2408 = vsyncadd (%p3114_p0), %s584_s23, 4294967040  ;;  %s1917_s14 = sshll.u32 %s2717_s24, 4  ;;  %p680_p6 = scmp.lt.s32.totalorder %s2443_s20, 1 }
  0x60   : > { %p685_p1 = scmp.lt.s32.totalorder %s2439_s19, 1  ;;  %s3115_s0 = sld [smem:[#allocation27_spill]] }
  0x61   : > { %s681_s25 = scalar_select %p680_p6, %s2443_s20, 1 }
  0x62   : > { %s2738_s12 = scalar_select %p685_p1, %s2439_s19, 1 }
  0x63   : > { %s1965_s26 = sshll.u32 %s681_s25, 4  ;;  %s3116_s2 = sld [smem:[#allocation29_spill]] }
  0x64   : > { %s1966_s28 = sshll.u32 %s2738_s12, 4  ;;  %s3117_s22 = sld [smem:[#allocation30_spill]] }
  0x65   : > { %s1968_s7 = sshll.u32 %s2738_s12, 5  ;;  %s3121_s10 = sld [smem:[#allocation35_spill]] }
  0x66   : > { %s684_s5 = scalar_lea.vmem %s3115_s0, %s1965_s26  ;;  %s3123_s25 = sld [smem:[#allocation37_spill]] }
  0x67   : > { %s3124_s8 = sld [smem:[#allocation38_spill]]  ;;  %s2790_s9 = scalar_lea.vmem [#allocation8], %s1917_s14 }
  0x68   : > { %p1926_p12 = scmp.ne.s32.totalorder %s2439_s19, 0 }
  0x69   : > { %s689_s4 = scalar_lea.vmem %s3116_s2, %s1966_s28  ;;  %s3120_s2 = sld [smem:[#allocation34_spill]] }
  0x6a   : > { %s2754_s21 = scalar_lea.vmem %s3117_s22, %s1966_s28  ;;  %s3122_s28 = sld [smem:[#allocation36_spill]] }
  0x6b   : > { %s711_s6 = scalar_lea.vmem %s3121_s10, %s2738_s12 }
  0x6c   : > { %s717_s17 = scalar_lea.vmem %s3123_s25, %s2738_s12 }
  0x6d   : > { %s720_s0 = scalar_lea.vmem %s3124_s8, %s2738_s12 }
  0x6f   : > { %s2768_s15 = scalar_lea.vmem %s3120_s2, %s1968_s7  ;;  %s3125_s2 = sld [smem:[#allocation39_spill]] }
  0x70   : > { %s714_s30 = scalar_lea.vmem %s3122_s28, %s2738_s12 }
  0x71   : > { %728 = sbr.rel (%p1926_p12) target bundleno = 120 (0x78), region = 88 }
  0x75   : > { %s723_s7 = scalar_lea.vmem %s3125_s2, %s2738_s12 }
  0x76   : > { %v729_v0 = vld [vmem:[%s684_s5] sm:$0xff]  ;;  %vm731_vm0 = vcmask 261120   ;;  %v730_v1 = vld [vmem:[%s684_s5 + $0x8] sm:$0xff] }
  0x77   : > { %732 = vst.msk [vmem:[#allocation2] sm:$0xff] %vm731_vm0, %v729_v0  ;;  %733 = vst.msk [vmem:[#allocation2 + $0x8] sm:$0xff] %vm731_vm0, %v730_v1 }
  0x78 PF: > { %v2225_v2 = vld [vmem:[%s689_s4 + $0x8] sm:$0xff]   ;;  %v2461_v3 = vmov 0.0   ;;  %v2226_v4 = vld [vmem:[%s689_s4] sm:$0xff]   ;;  %vm2462_vm1 = vmmov 0   ;;  %vm784_vm2 = vcmask 261120   ;;  %s3126_s14 = scalar_lea.vmem %s3041_s3, %s2738_s12  ;;  %s2463_s5 = smov 120  }
  0x79   : > { %2000 = vmatprep.subr.bf16.mxu0 %v2461_v3  ;;  %2008 = vmatprep.subr.bf16.mxu1 %v2461_v3  ;;  %v1927_v9 = vld [vmem:[%s3126_s14] ss:$0 sm:$0xff]  ;;  %s2464_s4 = smov 96   ;;  %s2465_s27 = smov 80   ;;  %vm833_vm3 = vcmask 64512   ;;  %vm891_vm4 = vcmask 130048  }
  0x7a   : > { %2001 = vmatpush3.bf16.msra.mxu0 %v2225_v2  ;;  %2004 = vmatprep.mubr.msk.bf16.mxu0 %vm2462_vm1, %v2461_v3  ;;  %s2466_s23 = smov 88   ;;  %s2467_s22 = smov 72   ;;  %vm1365_vm5 = vcmask 195584   ;;  %vm1572_vm6 = vcmask 523264  }
  0x7b   : > { %2002 = vmatprep.subr.bf16.mxu0 %v2461_v3  ;;  %2010 = vmatprep.mubr.msk.bf16.mxu1 %vm2462_vm1, %v2461_v3  ;;  %s2468_s11 = smov 112   ;;  %s2469_s28 = smov 104  }
  0x7c   : > { %s3127_s13 = scalar_lea.vmem [#allocation3], %s2717_s24  ;;  %s2470_s18 = smov 56  }
  0x7d   : > { %v1932_v28 = vld [vmem:[%s3127_s13] ss:$0 sm:$0xff]  ;;  %s2471_s25 = smov 64   ;;  %s2472_s1 = smov 48  }
  0x7e   : > { %v2797_v5 = vld [vmem:[#allocation2] sm:$0xff]  ;;  %v2799_v6 = vld [vmem:[#allocation2 + $0x8] sm:$0xff]  ;;  %2003 = vmatpush3.bf16.msra.mxu0 %v2226_v4  ;;  %s2473_s26 = smov 40   ;;  %s2474_s8 = smov 8  }
  0x7f   : > { %v765_v7 = vpack.c.bf16 %v2799_v6, %v2797_v5  ;;  %2014 = vmatprep.subr.bf16.mxu0 %v2461_v3  ;;  %s2475_s29 = smov 16   ;;  %s2476_s2 = smov 24  }
  0x80   : > { %s3128_s10 = sld [smem:[#allocation31_spill]]  ;;  %p1958_p13 = scmp.ne.s32.totalorder %s2439_s19, 1 }
  0x81   : > { %2005 = vmatmul.mubr.msk.bf16.vlgmr.msra.gmra.mxu0 %vm784_vm2, %v765_v7 }
  0x82   : > { %2016 = vmatprep.mubr.msk.bf16.mxu0 %vm2462_vm1, %v2461_v3 }
  0x86   : > { %s3129_s14 = scalar_lea.vmem %s3128_s10, %s2738_s12 }
 0x141   : > { %v822_v8 = vpop.f32.mrf.mxu0 }
 0x142   : > { %v823_v12 = vadd.f32 %v1927_v9, %v822_v8 }
 0x143   : > { %v2006_v10 = vpop.f32.mrf.mxu0 }
 0x145   : > { %v825_v11 = vpop.f32.mrf.mxu0 }
 0x146   : > { %v826_v13 = vadd.f32 %v1927_v9, %v825_v11 }
 0x147   : > { %v2007_v14 = vpop.f32.mrf.mxu0 }
 0x148   : > { %v2815_v15 = vpack.c.bf16 %v826_v13, %v823_v12 }
 0x14a   : > { %962 = vrot.lane.b32.xlu1 %v2815_v15, %s2463_s5  ;;  %831 = vrot.lane.b32.xlu0 %v2815_v15, %s2464_s4  ;;  %s3130_s5 = scalar_lea.vmem [#allocation6], %s2726_s16 }
 0x14b   : > { %s3131_s4 = smov %s3130_s5 }
 0x14e   : > { %1089 = vrot.lane.b32.xlu1 %v2815_v15, %s2465_s27  ;;  %964 = vrot.lane.b32.xlu0 %v2815_v15, %s2466_s23 }
 0x152   : > { %1214 = vrot.lane.b32.xlu1 %v2815_v15, %s2467_s22  ;;  %1087 = vrot.lane.b32.xlu0 %v2815_v15, %s2468_s11 }
 0x156   : > { %1212 = vrot.lane.b32.xlu0 %v2815_v15, %s2469_s28 }
 0x1bc   : > { %v832_v16 = vpop.permute.xlu0 %831  ;;  %v963_v19 = vpop.permute.xlu1 %962 }
 0x1bd   : > { %v838_v17 = vsel %vm833_vm3, %v832_v16, 0 }
 0x1be   : > { %2009 = vmatpush3.bf16.xpose.msra.mxu1 %v838_v17 }
 0x1bf   : > { %2020 = vmatprep.subr.bf16.mxu1 %v2461_v3 }
 0x1c0   : > { %v965_v18 = vpop.permute.xlu0 %964  ;;  %v1090_v21 = vpop.permute.xlu1 %1089 }
 0x1c1   : > { %v970_v20 = vsel %vm833_vm3, %v965_v18, 0  ;;  %v1095_v22 = vsel %vm833_vm3, %v1090_v21, 0 }
 0x1c4   : > { %v1215_v23 = vpop.permute.xlu1 %1214  ;;  %v1088_v24 = vpop.permute.xlu0 %1087 }
 0x1c5   : > { %2011 = vmatmul.mubr.msk.bf16.vlgmr.msra.gmra.mxu1 %vm833_vm3, %v2815_v15  ;;  %v1220_v25 = vsel %vm833_vm3, %v1215_v23, 0 }
 0x1c6   : > { %2021 = vmatpush3.bf16.xpose.msra.mxu1 %v970_v20  ;;  %2022 = vmatprep.mubr.msk.bf16.mxu1 %vm2462_vm1, %v2461_v3 }
 0x1c7   : > { %2032 = vmatprep.subr.bf16.mxu1 %v2461_v3 }
 0x1c8   : > { %v1213_v26 = vpop.permute.xlu0 %1212 }
 0x1cd   : > { %2023 = vmatmul.mubr.msk.bf16.vlgmr.msra.gmra.mxu1 %vm833_vm3, %v963_v19 }
 0x1ce   : > { %2033 = vmatpush3.bf16.xpose.msra.mxu1 %v1095_v22  ;;  %2034 = vmatprep.mubr.msk.bf16.mxu1 %vm2462_vm1, %v2461_v3 }
 0x1cf   : > { %2044 = vmatprep.subr.bf16.mxu1 %v2461_v3 }
 0x1d5   : > { %2035 = vmatmul.mubr.msk.bf16.vlgmr.msra.gmra.mxu1 %vm833_vm3, %v1088_v24 }
 0x1d6   : > { %2045 = vmatpush3.bf16.xpose.msra.mxu1 %v1220_v25  ;;  %2046 = vmatprep.mubr.msk.bf16.mxu1 %vm2462_vm1, %v2461_v3 }
 0x1d7   : > { %2056 = vmatprep.subr.bf16.mxu1 %v2461_v3 }
 0x1dd   : > { %2047 = vmatmul.mubr.msk.bf16.vlgmr.msra.gmra.mxu1 %vm833_vm3, %v1213_v26 }
 0x1de   : > { %2060 = vmatprep.mubr.msk.bf16.mxu1 %vm2462_vm1, %v2461_v3 }
 0x285   : > { %v874_v27 = vpop.f32.mrf.mxu1 }
 0x286   : > { %v881_v29 = vmul.f32 0.35355338, %v874_v27 }
 0x287   : > { %v2012_v30 = vpop.f32.mrf.mxu1 }
 0x288   : > { %v889_v31 = vadd.f32 %v1932_v28, %v881_v29 }
 0x289   : > { %v877_v32 = vpop.f32.mrf.mxu1 }
 0x28a   : > { %v882_v33 = vmul.f32 0.35355338, %v877_v32  ;;  %v892_v34 = vsel %vm891_vm4, %v889_v31, -inf }
 0x28b   : > { %893 = vmax.xlane.f32.xlu1 %v892_v34  ;;  %v2013_v35 = vpop.f32.mrf.mxu1 }
 0x28c   : > { %v890_v36 = vadd.f32 %v1932_v28, %v882_v33 }
 0x28d   : > { %v1006_v37 = vpop.f32.mrf.mxu1 }
 0x28e   : > { %v1013_v38 = vmul.f32 0.35355338, %v1006_v37  ;;  %v895_v39 = vsel %vm891_vm4, %v890_v36, -inf }
 0x28f   : > { %896 = vmax.xlane.f32.xlu0 %v895_v39  ;;  %v2024_v40 = vpop.f32.mrf.mxu1 }
 0x290   : > { %v1015_v41 = vadd.f32 %v1932_v28, %v1013_v38 }
 0x291   : > { %v1009_v42 = vpop.f32.mrf.mxu1 }
 0x292   : > { %v1014_v43 = vmul.f32 0.35355338, %v1009_v42  ;;  %v1017_v44 = vsel %vm891_vm4, %v1015_v41, -inf }
 0x293   : > { %1018 = vmax.xlane.f32.xlu0 %v1017_v44  ;;  %v2025_v45 = vpop.f32.mrf.mxu1 }
 0x294   : > { %v1016_v46 = vadd.f32 %v1932_v28, %v1014_v43 }
 0x295   : > { %v1131_v47 = vpop.f32.mrf.mxu1 }
 0x296   : > { %v1138_v48 = vmul.f32 0.35355338, %v1131_v47  ;;  %v1020_v49 = vsel %vm891_vm4, %v1016_v46, -inf }
 0x297   : > { %1021 = vmax.xlane.f32.xlu1 %v1020_v49  ;;  %v2036_v50 = vpop.f32.mrf.mxu1 }
 0x298   : > { %v1140_v51 = vadd.f32 %v1932_v28, %v1138_v48 }
 0x299   : > { %v1134_v52 = vpop.f32.mrf.mxu1 }
 0x29a   : > { %v1139_v53 = vmul.f32 0.35355338, %v1134_v52  ;;  %v1142_v54 = vsel %vm891_vm4, %v1140_v51, -inf }
 0x29b   : > { %1143 = vmax.xlane.f32.xlu0 %v1142_v54  ;;  %v2037_v55 = vpop.f32.mrf.mxu1 }
 0x29c   : > { %v1141_v56 = vadd.f32 %v1932_v28, %v1139_v53 }
 0x29d   : > { %v1256_v57 = vpop.f32.mrf.mxu1 }
 0x29e   : > { %v1263_v58 = vmul.f32 0.35355338, %v1256_v57  ;;  %v1145_v59 = vsel %vm891_vm4, %v1141_v56, -inf }
 0x29f   : > { %1146 = vmax.xlane.f32.xlu1 %v1145_v59  ;;  %v2048_v60 = vpop.f32.mrf.mxu1 }
 0x2a0   : > { %v1265_v61 = vadd.f32 %v1932_v28, %v1263_v58 }
 0x2a1   : > { %v1259_v62 = vpop.f32.mrf.mxu1 }
 0x2a2   : > { %v1264_v63 = vmul.f32 0.35355338, %v1259_v62  ;;  %v1267_v0 = vsel %vm891_vm4, %v1265_v61, -inf }
 0x2a3   : > { %1268 = vmax.xlane.f32.xlu0 %v1267_v0  ;;  %v2049_v1 = vpop.f32.mrf.mxu1 }
 0x2a4   : > { %v1266_v2 = vadd.f32 %v1932_v28, %v1264_v63 }
 0x2a6   : > { %v1270_v4 = vsel %vm891_vm4, %v1266_v2, -inf }
 0x2a7   : > { %1271 = vmax.xlane.f32.xlu1 %v1270_v4 }
 0x314   : > { %v894_v7 = vpop.xlane.xlu1 %893 }
 0x315   : > { %v898_v8 = vsub.f32 %v889_v31, %v894_v7 }
 0x317   : > { %v900_v9 = vmul.f32 1.442695, %v898_v8 }
 0x318   : > { %v897_v10 = vpop.xlane.xlu0 %896 }
 0x319   : > { %2235 = vpow2.f32 %v900_v9  ;;  %v899_v11 = vsub.f32 %v890_v36, %v897_v10 }
 0x31b   : > { %v902_v12 = vmul.f32 1.442695, %v899_v11 }
 0x31c   : > { %v1019_v13 = vpop.xlane.xlu0 %1018 }
 0x31d   : > { %2237 = vpow2.f32 %v902_v12  ;;  %v1023_v14 = vsub.f32 %v1015_v41, %v1019_v13 }
 0x31f   : > { %v1025_v16 = vmul.f32 1.442695, %v1023_v14 }
 0x320   : > { %v1022_v23 = vpop.xlane.xlu1 %1021 }
 0x321   : > { %2239 = vpow2.f32 %v1025_v16  ;;  %v1024_v24 = vsub.f32 %v1016_v46, %v1022_v23 }
 0x323   : > { %v1027_v28 = vmul.f32 1.442695, %v1024_v24 }
 0x324   : > { %v1144_v25 = vpop.xlane.xlu0 %1143 }
 0x325   : > { %v1148_v27 = vsub.f32 %v1140_v51, %v1144_v25  ;;  %2241 = vpow2.f32 %v1027_v28 }
 0x326   : > { %v2236_v17 = vpop.eup %2235 }
 0x327   : > { %v904_v18 = vsel %vm891_vm4, %v2236_v17, 0.0  ;;  %v1150_v32 = vmul.f32 1.442695, %v1148_v27 }
 0x328   : > { %905 = vadd.xlane.f32.xlu0 %v904_v18  ;;  %v1147_v26 = vpop.xlane.xlu1 %1146 }
 0x329   : > { %v1149_v29 = vsub.f32 %v1141_v56, %v1147_v26  ;;  %2243 = vpow2.f32 %v1150_v32  ;;  %v2227_v26 = vld [vmem:[%s2754_s21 + $0x8] sm:$0xff]  }
 0x32a   : > { %v2238_v19 = vpop.eup %2237  ;;  %2057 = vmatpush3.bf16.msra.mxu1 %v2227_v26 }
 0x32b   : > { %v907_v20 = vsel %vm891_vm4, %v2238_v19, 0.0  ;;  %v1152_v34 = vmul.f32 1.442695, %v1149_v29  ;;  %2058 = vmatprep.subr.bf16.mxu1 %v2461_v3 }
 0x32c   : > { %908 = vadd.xlane.f32.xlu1 %v907_v20  ;;  %v1269_v30 = vpop.xlane.xlu0 %1268 }
 0x32d   : > { %v1273_v33 = vsub.f32 %v1265_v61, %v1269_v30  ;;  %2245 = vpow2.f32 %v1152_v34 }
 0x32e   : > { %v2857_v21 = vpop.eup %2239 }
 0x32f   : > { %v1029_v22 = vsel %vm891_vm4, %v2857_v21, 0.0  ;;  %v1275_v36 = vmul.f32 1.442695, %v1273_v33 }
 0x330   : > { %1030 = vadd.xlane.f32.xlu0 %v1029_v22  ;;  %v1272_v31 = vpop.xlane.xlu1 %1271 }
 0x331   : > { %v1274_v35 = vsub.f32 %v1266_v2, %v1272_v31  ;;  %2247 = vpow2.f32 %v1275_v36  ;;  %v2228_v31 = vld [vmem:[%s2754_s21] sm:$0xff]  }
 0x332   : > { %v2242_v38 = vpop.eup %2241  ;;  %2059 = vmatpush3.bf16.msra.mxu1 %v2228_v31 }
 0x333   : > { %v1277_v37 = vmul.f32 1.442695, %v1274_v35  ;;  %v1032_v40 = vsel %vm891_vm4, %v2242_v38, 0.0  ;;  %2072 = vmatprep.subr.bf16.mxu1 %v2461_v3 }
 0x335   : > { %2249 = vpow2.f32 %v1277_v37 }
 0x336   : > { %v2244_v39 = vpop.eup %2243 }
 0x337   : > { %v1154_v44 = vsel %vm891_vm4, %v2244_v39, 0.0 }
 0x33a   : > { %v2246_v41 = vpop.eup %2245 }
 0x33b   : > { %v1157_v43 = vsel %vm891_vm4, %v2246_v41, 0.0 }
 0x33d   : > { %1040 = vrot.lane.b32.xlu1 %v2815_v15, %s2470_s18 }
 0x33e   : > { %v2864_v42 = vpop.eup %2247 }
 0x33f   : > { %v1279_v47 = vsel %vm891_vm4, %v2864_v42, 0.0 }
 0x342   : > { %v2250_v45 = vpop.eup %2249 }
 0x343   : > { %v1282_v46 = vsel %vm891_vm4, %v2250_v45, 0.0 }
 0x346   : > { %915 = vrot.lane.b32.xlu0 %v2815_v15, %s2471_s25 }
 0x361   : > { %1033 = vadd.xlane.f32.xlu1 %v1032_v40 }
 0x365   : > { %1158 = vadd.xlane.f32.xlu1 %v1157_v43  ;;  %1155 = vadd.xlane.f32.xlu0 %v1154_v44 }
 0x369   : > { %1283 = vadd.xlane.f32.xlu1 %v1282_v46  ;;  %1280 = vadd.xlane.f32.xlu0 %v1279_v47 }
 0x37a   : > { %1165 = vrot.lane.b32.xlu1 %v2815_v15, %s2472_s1 }
 0x37f   : > { %1290 = vrot.lane.b32.xlu0 %v2815_v15, %s2473_s26 }
 0x3b1   : > { %v906_v48 = vpop.xlane.xlu0 %905 }
 0x3b2   : > { %2251 = vrcp.f32 %v906_v48 }
 0x3b5   : > { %v909_v49 = vpop.xlane.xlu1 %908 }
 0x3b6   : > { %2253 = vrcp.f32 %v909_v49 }
 0x3b9   : > { %v1031_v50 = vpop.xlane.xlu0 %1030  ;;  %v1041_v57 = vpop.permute.xlu1 %1040 }
 0x3ba   : > { %2255 = vrcp.f32 %v1031_v50 }
 0x3bd   : > { %v916_v51 = vpop.permute.xlu0 %915 }
 0x3be   : > { %2015 = vmatpush3.bf16.msra.mxu0 %v916_v51 }
 0x3bf   : > { %2026 = vmatprep.subr.bf16.mxu0 %v2461_v3  ;;  %v2252_v52 = vpop.eup %2251 }
 0x3c0   : > { %v912_v54 = vmul.f32 %v2252_v52, %v2236_v17 }
 0x3c3   : > { %v2254_v53 = vpop.eup %2253 }
 0x3c4   : > { %v913_v55 = vmul.f32 %v2254_v53, %v2238_v19 }
 0x3c6   : > { %v914_v56 = vpack.c.bf16 %v913_v55, %v912_v54 }
 0x3c7   : > { %v2256_v62 = vpop.eup %2255 }
 0x3c8   : > { %2017 = vmatmul.mubr.msk.bf16.vlgmr.msra.gmra.mxu0 %vm891_vm4, %v914_v56  ;;  %v1037_v0 = vmul.f32 %v2256_v62, %v2857_v21  ;;  %v1940_v56 = vld [vmem:[%s3129_s14] ss:$0 sm:$0xff] }
 0x3c9   : > { %2027 = vmatpush3.bf16.msra.mxu0 %v1041_v57  ;;  %2028 = vmatprep.mubr.msk.bf16.mxu0 %vm2462_vm1, %v2461_v3 }
 0x3ca   : > { %2038 = vmatprep.subr.bf16.mxu0 %v2461_v3 }
 0x3ea   : > { %v1034_v15 = vpop.xlane.xlu1 %1033 }
 0x3eb   : > { %2257 = vrcp.f32 %v1034_v15 }
 0x3ee   : > { %v1159_v58 = vpop.xlane.xlu1 %1158  ;;  %v1156_v59 = vpop.xlane.xlu0 %1155 }
 0x3ef   : > { %2259 = vrcp.f32 %v1159_v58 }
 0x3f0   : > { %2261 = vrcp.f32 %v1156_v59 }
 0x3f2   : > { %v1284_v60 = vpop.xlane.xlu1 %1283  ;;  %v1281_v61 = vpop.xlane.xlu0 %1280 }
 0x3f3   : > { %2263 = vrcp.f32 %v1284_v60 }
 0x3f4   : > { %2265 = vrcp.f32 %v1281_v61 }
 0x3f6   : > { %v1166_v8 = vpop.permute.xlu1 %1165  ;;  %v1291_v14 = vpop.permute.xlu0 %1290 }
 0x3f8   : > { %v2258_v63 = vpop.eup %2257 }
 0x3f9   : > { %v1038_v1 = vmul.f32 %v2258_v63, %v2242_v38 }
 0x3fb   : > { %v1039_v2 = vpack.c.bf16 %v1038_v1, %v1037_v0 }
 0x3fc   : > { %v2260_v4 = vpop.eup %2259 }
 0x3fd   : > { %v2262_v7 = vpop.eup %2261  ;;  %2029 = vmatmul.mubr.msk.bf16.vlgmr.msra.gmra.mxu0 %vm891_vm4, %v1039_v2  ;;  %v1163_v10 = vmul.f32 %v2260_v4, %v2246_v41 }
 0x3fe   : > { %2039 = vmatpush3.bf16.msra.mxu0 %v1166_v8  ;;  %2040 = vmatprep.mubr.msk.bf16.mxu0 %vm2462_vm1, %v2461_v3  ;;  %v1162_v9 = vmul.f32 %v2262_v7, %v2244_v39 }
 0x3ff   : > { %2050 = vmatprep.subr.bf16.mxu0 %v2461_v3 }
 0x400   : > { %v2264_v11 = vpop.eup %2263  ;;  %v1164_v12 = vpack.c.bf16 %v1163_v10, %v1162_v9 }
 0x401   : > { %v2266_v13 = vpop.eup %2265  ;;  %v1288_v17 = vmul.f32 %v2264_v11, %v2250_v45 }
 0x402   : > { %v1287_v16 = vmul.f32 %v2266_v13, %v2864_v42 }
 0x404   : > { %v1289_v18 = vpack.c.bf16 %v1288_v17, %v1287_v16  ;;  %v2231_v16 = vld [vmem:[%s2768_s15 + $0x18] sm:$0xff]  }
 0x405   : > { %2041 = vmatmul.mubr.msk.bf16.vlgmr.msra.gmra.mxu0 %vm891_vm4, %v1164_v12 }
 0x406   : > { %2051 = vmatpush3.bf16.msra.mxu0 %v1291_v14  ;;  %2052 = vmatprep.mubr.msk.bf16.mxu0 %vm2462_vm1, %v2461_v3  ;;  %v2230_v14 = vld [vmem:[%s3131_s4] sm:$0xff]  }
 0x407   : > { %2064 = vmatprep.subr.bf16.mxu0 %v2461_v3 }
 0x40d   : > { %2053 = vmatmul.mubr.msk.bf16.vlgmr.msra.gmra.mxu0 %vm891_vm4, %v1289_v18 }
 0x40e   : > { %2068 = vmatprep.mubr.msk.bf16.mxu0 %vm2462_vm1, %v2461_v3 }
 0x488   : > { %v955_v19 = vpop.f32.mrf.mxu0 }
 0x48a   : > { %v2018_v20 = vpop.f32.mrf.mxu0 }
 0x48c   : > { %v958_v21 = vpop.f32.mrf.mxu0 }
 0x48e   : > { %v2019_v22 = vpop.f32.mrf.mxu0 }
 0x4bd   : > { %v1080_v23 = vpop.f32.mrf.mxu0 }
 0x4bf   : > { %v2030_v24 = vpop.f32.mrf.mxu0 }
 0x4c1   : > { %v1083_v25 = vpop.f32.mrf.mxu0 }
 0x4c2   : > { %v2210_v27 = vpack.i.bf16 %v1083_v25, %v1080_v23  ;;  %v1944_v25 = vld [vmem:[%s714_s30] ss:$0 sm:$0xff] }
 0x4c3   : > { %v2031_v28 = vpop.f32.mrf.mxu0 }
 0x4c4   : > { %2211 = vrot.lane.b32.xlu1 %v2210_v27, %s2474_s8 }
 0x4c5   : > { %v1205_v29 = vpop.f32.mrf.mxu0 }
 0x4c7   : > { %v2042_v30 = vpop.f32.mrf.mxu0 }
 0x4c9   : > { %v1208_v32 = vpop.f32.mrf.mxu0 }
 0x4ca   : > { %v2215_v33 = vpack.i.bf16 %v1208_v32, %v1205_v29  ;;  %v1945_v29 = vld [vmem:[%s717_s17] ss:$0 sm:$0xff]  ;;  %s3134_s17 = sld [smem:[#allocation33_spill]] }
 0x4cb   : > { %v2043_v34 = vpop.f32.mrf.mxu0 }
 0x4cc   : > { %2216 = vrot.lane.b32.xlu0 %v2215_v33, %s2475_s29  ;;  %v2232_v34 = vld [vmem:[%s2768_s15 + $0x10] sm:$0xff]  }
 0x4cd   : > { %v1330_v35 = vpop.f32.mrf.mxu0 }
 0x4cf   : > { %v2054_v36 = vpop.f32.mrf.mxu0 }
 0x4d0   : > { %v2234_v36 = vld [vmem:[%s2768_s15] sm:$0xff]   ;;  %s3135_s18 = scalar_lea.vmem %s3134_s17, %s2738_s12 }
 0x4d1   : > { %v1333_v37 = vpop.f32.mrf.mxu0 }
 0x4d2   : > { %v2220_v38 = vpack.i.bf16 %v1333_v37, %v1330_v35  ;;  %v2233_v35 = vld [vmem:[%s2768_s15 + $0x8] sm:$0xff]   ;;  %v1946_v37 = vld [vmem:[%s3135_s18] ss:$0 sm:$0xff] }
 0x4d3   : > { %v2055_v39 = vpop.f32.mrf.mxu0 }
 0x4d4   : > { %2221 = vrot.lane.b32.xlu1 %v2220_v38, %s2476_s2 }
 0x536   : > { %v2212_v40 = vpop.permute.xlu1 %2211 }
 0x537   : > { %v2214_v42 = vunpack.i.h.bf16 %v2212_v40  ;;  %v2213_v43 = vunpack.i.l.bf16 %v2212_v40 }
 0x539   : > { %v1362_v47 = vsel %vm833_vm3, %v958_v21, %v2214_v42  ;;  %v1361_v48 = vsel %vm833_vm3, %v955_v19, %v2213_v43 }
 0x53e   : > { %v2217_v41 = vpop.permute.xlu0 %2216 }
 0x53f   : > { %v2219_v44 = vunpack.i.h.bf16 %v2217_v41  ;;  %v2218_v45 = vunpack.i.l.bf16 %v2217_v41 }
 0x541   : > { %v1364_v51 = vsel %vm891_vm4, %v1362_v47, %v2219_v44  ;;  %v1363_v52 = vsel %vm891_vm4, %v1361_v48, %v2218_v45 }
 0x546   : > { %v2222_v46 = vpop.permute.xlu1 %2221 }
 0x547   : > { %v2224_v49 = vunpack.i.h.bf16 %v2222_v46  ;;  %v2223_v50 = vunpack.i.l.bf16 %v2222_v46 }
 0x549   : > { %v1367_v53 = vsel %vm1365_vm5, %v1364_v51, %v2224_v49  ;;  %v1366_v54 = vsel %vm1365_vm5, %v1363_v52, %v2223_v50 }
 0x54a   : > { %v1368_v55 = vpack.c.bf16 %v1367_v53, %v1366_v54 }
 0x54c   : > { %2061 = vmatmul.mubr.msk.bf16.vlgmr.msra.gmra.mxu1 %vm784_vm2, %v1368_v55 }
 0x54d   : > { %2080 = vmatprep.mubr.msk.bf16.mxu1 %vm2462_vm1, %v2461_v3  ;;  %2073 = vmatpush3.bf16.msra.mxu1 %v2231_v16 }
 0x54e   : > { %2074 = vmatprep.subr.bf16.mxu1 %v2461_v3 }
 0x551   : > { %2075 = vmatpush3.bf16.msra.mxu1 %v2232_v34 }
 0x552   : > { %2076 = vmatprep.subr.bf16.mxu1 %v2461_v3 }
 0x555   : > { %2077 = vmatpush3.bf16.msra.mxu1 %v2233_v35 }
 0x556   : > { %2078 = vmatprep.subr.bf16.mxu1 %v2461_v3 }
 0x559   : > { %2079 = vmatpush3.bf16.msra.mxu1 %v2234_v36 }
 0x60c   : > { %v1424_v57 = vpop.f32.mrf.mxu1 }
 0x60d   : > { %v1425_v15 = vadd.f32 %v1940_v56, %v1424_v57 }
 0x60e   : > { %v2062_v58 = vpop.f32.mrf.mxu1 }
 0x60f   : > { %v1431_v59 = vadd.f32 %v1425_v15, %v2797_v5 }
 0x610   : > { %v1427_v60 = vpop.f32.mrf.mxu1 }
 0x611   : > { %v1428_v61 = vadd.f32 %v1940_v56, %v1427_v60  ;;  %v1433_v62 = vsel %vm784_vm2, %v1431_v59, 0.0 }
 0x612   : > { %1434 = vadd.xlane.f32.xlu0 %v1433_v62  ;;  %v2063_v63 = vpop.f32.mrf.mxu1 }
 0x613   : > { %v1432_v0 = vadd.f32 %v1428_v61, %v2799_v6  ;;  %v2229_v6 = vld [vmem:[%s3130_s5 + $0x8] sm:$0xff]  }
 0x614   : > { %2065 = vmatpush3.bf16.msra.mxu0 %v2229_v6 }
 0x615   : > { %v1436_v1 = vsel %vm784_vm2, %v1432_v0, 0.0  ;;  %2066 = vmatprep.subr.bf16.mxu0 %v2461_v3  ;;  %v1950_v3 = vld [vmem:[%s711_s6] ss:$0 sm:$0xff] }
 0x616   : > { %1437 = vadd.xlane.f32.xlu1 %v1436_v1 }
 0x618   : > { %2067 = vmatpush3.bf16.msra.mxu0 %v2230_v14 }
 0x69b   : > { %v1435_v2 = vpop.xlane.xlu0 %1434 }
 0x69c   : > { %v1440_v4 = vmul.f32 0.03125, %v1435_v2 }
 0x69e   : > { %v1442_v7 = vsub.f32 %v1431_v59, %v1440_v4 }
 0x69f   : > { %v1438_v8 = vpop.xlane.xlu1 %1437 }
 0x6a0   : > { %v1441_v9 = vmul.f32 0.03125, %v1438_v8  ;;  %v1444_v5 = vmul.f32 %v1442_v7, %v1442_v7 }
 0x6a2   : > { %v1443_v10 = vsub.f32 %v1432_v0, %v1441_v9  ;;  %v1446_v11 = vsel %vm784_vm2, %v1444_v5, 0.0 }
 0x6a3   : > { %1447 = vadd.xlane.f32.xlu0 %v1446_v11  ;;  %v1956_v11 = vld [vmem:[%s720_s0] ss:$0 sm:$0xff] }
 0x6a4   : > { %v1445_v12 = vmul.f32 %v1443_v10, %v1443_v10 }
 0x6a6   : > { %v1449_v13 = vsel %vm784_vm2, %v1445_v12, 0.0 }
 0x6a7   : > { %1450 = vadd.xlane.f32.xlu0 %v1449_v13  ;;  %v1957_v13 = vld [vmem:[%s723_s7] ss:$0 sm:$0xff] }
 0x72c   : > { %v1448_v17 = vpop.xlane.xlu0 %1447 }
 0x72d   : > { %v1452_v18 = vmul.f32 0.03125, %v1448_v17 }
 0x72f   : > { %v1454_v19 = vadd.f32 1e-05, %v1452_v18 }
 0x730   : > { %v1451_v20 = vpop.xlane.xlu0 %1450 }
 0x731   : > { %2267 = vrsqrt.f32 %v1454_v19  ;;  %v1453_v21 = vmul.f32 0.03125, %v1451_v20 }
 0x733   : > { %v1455_v22 = vadd.f32 1e-05, %v1453_v21 }
 0x735   : > { %2269 = vrsqrt.f32 %v1455_v22 }
 0x73e   : > { %v2268_v23 = vpop.eup %2267 }
 0x73f   : > { %v1458_v24 = vmul.f32 %v2268_v23, %v1442_v7 }
 0x741   : > { %v1466_v28 = vmul.f32 %v1944_v25, %v1458_v24 }
 0x742   : > { %v2270_v26 = vpop.eup %2269 }
 0x743   : > { %v1459_v27 = vmul.f32 %v2270_v26, %v1443_v10  ;;  %v1474_v31 = vadd.f32 %v1945_v29, %v1466_v28 }
 0x745   : > { %v1467_v30 = vmul.f32 %v1944_v25, %v1459_v27 }
 0x747   : > { %v1475_v32 = vadd.f32 %v1945_v29, %v1467_v30 }
 0x749   : > { %v1476_v33 = vpack.c.bf16 %v1475_v32, %v1474_v31 }
 0x74b   : > { %2069 = vmatmul.mubr.msk.bf16.vlgmr.msra.gmra.mxu0 %vm784_vm2, %v1476_v33 }
 0x80b   : > { %v1532_v38 = vpop.f32.mrf.mxu0 }
 0x80c   : > { %v1533_v40 = vadd.f32 %v1946_v37, %v1532_v38 }
 0x80d   : > { %v2070_v39 = vpop.f32.mrf.mxu0 }
 0x80e   : > { %v1539_v44 = vmax.f32 %v1533_v40, 0.0 }
 0x80f   : > { %v1535_v41 = vpop.f32.mrf.mxu0 }
 0x810   : > { %v1536_v42 = vadd.f32 %v1946_v37, %v1535_v41 }
 0x811   : > { %v2071_v43 = vpop.f32.mrf.mxu0 }
 0x812   : > { %v1540_v45 = vmax.f32 %v1536_v42, 0.0 }
 0x814   : > { %v1541_v46 = vpack.c.bf16 %v1540_v45, %v1539_v44 }
 0x816   : > { %2081 = vmatmul.mubr.msk.bf16.vlgmr.msra.gmra.mxu1 %vm1572_vm6, %v1541_v46 }
 0x8d6   : > { %v1610_v47 = vpop.f32.mrf.mxu1 }
 0x8d7   : > { %v1611_v48 = vadd.f32 %v1950_v3, %v1610_v47 }
 0x8d8   : > { %v2082_v49 = vpop.f32.mrf.mxu1 }
 0x8d9   : > { %v1617_v50 = vadd.f32 %v1611_v48, %v1474_v31 }
 0x8da   : > { %v1613_v51 = vpop.f32.mrf.mxu1 }
 0x8db   : > { %v1614_v52 = vadd.f32 %v1950_v3, %v1613_v51  ;;  %v1619_v53 = vsel %vm784_vm2, %v1617_v50, 0.0 }
 0x8dc   : > { %1620 = vadd.xlane.f32.xlu1 %v1619_v53  ;;  %v2083_v54 = vpop.f32.mrf.mxu1 }
 0x8dd   : > { %v1618_v55 = vadd.f32 %v1614_v52, %v1475_v32 }
 0x8df   : > { %v1622_v56 = vsel %vm784_vm2, %v1618_v55, 0.0 }
 0x8e0   : > { %1623 = vadd.xlane.f32.xlu0 %v1622_v56 }
 0x965   : > { %v1621_v57 = vpop.xlane.xlu1 %1620 }
 0x966   : > { %v1625_v15 = vmul.f32 0.03125, %v1621_v57 }
 0x968   : > { %v1627_v58 = vsub.f32 %v1617_v50, %v1625_v15 }
 0x969   : > { %v1624_v59 = vpop.xlane.xlu0 %1623 }
 0x96a   : > { %v1626_v60 = vmul.f32 0.03125, %v1624_v59  ;;  %v1629_v61 = vmul.f32 %v1627_v58, %v1627_v58 }
 0x96c   : > { %v1628_v62 = vsub.f32 %v1618_v55, %v1626_v60  ;;  %v1631_v63 = vsel %vm784_vm2, %v1629_v61, 0.0 }
 0x96d   : > { %1632 = vadd.xlane.f32.xlu1 %v1631_v63 }
 0x96e   : > { %v1630_v0 = vmul.f32 %v1628_v62, %v1628_v62 }
 0x970   : > { %v1634_v1 = vsel %vm784_vm2, %v1630_v0, 0.0 }
 0x971   : > { %1635 = vadd.xlane.f32.xlu0 %v1634_v1 }
 0x9f6   : > { %v1633_v2 = vpop.xlane.xlu1 %1632 }
 0x9f7   : > { %v1637_v4 = vmul.f32 0.03125, %v1633_v2 }
 0x9f9   : > { %v1639_v7 = vadd.f32 1e-05, %v1637_v4 }
 0x9fa   : > { %v1636_v8 = vpop.xlane.xlu0 %1635 }
 0x9fb   : > { %2271 = vrsqrt.f32 %v1639_v7  ;;  %v1638_v9 = vmul.f32 0.03125, %v1636_v8 }
 0x9fd   : > { %v1640_v5 = vadd.f32 1e-05, %v1638_v9 }
 0x9ff   : > { %2273 = vrsqrt.f32 %v1640_v5 }
 0xa08   : > { %v2272_v10 = vpop.eup %2271 }
 0xa09   : > { %v1643_v12 = vmul.f32 %v2272_v10, %v1627_v58 }
 0xa0b   : > { %v1651_v6 = vmul.f32 %v1956_v11, %v1643_v12 }
 0xa0c   : > { %v2274_v14 = vpop.eup %2273 }
 0xa0d   : > { %v1659_v16 = vadd.f32 %v1957_v13, %v1651_v6  ;;  %v1644_v17 = vmul.f32 %v2274_v14, %v1628_v62 }
 0xa0f   : > { %1661 = vst.msk [vmem:[#allocation2] sm:$0xff] %vm784_vm2, %v1659_v16  ;;  %v1652_v18 = vmul.f32 %v1956_v11, %v1644_v17  ;;  %1666 = sbr.rel (%p1958_p13) target bundleno = 2581 (0xa15), region = 92 }
 0xa11   : > { %v1660_v19 = vadd.f32 %v1957_v13, %v1652_v18 }
 0xa13   : > { %1662 = vst.msk [vmem:[#allocation2 + $0x8] sm:$0xff] %vm784_vm2, %v1660_v19 }
 0xa14   : > { %1667 = vst.msk [vmem:[%s2790_s9] sm:$0xff] %vm784_vm2, %v1659_v16  ;;  %1668 = vst.msk [vmem:[%s2790_s9 + $0x8] sm:$0xff] %vm784_vm2, %v1660_v19 }
 0xa15 PF: > { %s3139_s0 = sld [smem:[#allocation17_spill]]  ;;  %s1683_s16 = sshll.u32 %s2790_s9, 4  ;;  %s2975_s16 = int_to_ptr.vmem [resolvable:$true] %s1683_s16 }
 0xa16   : > { %s3140_s12 = sld [smem:[#allocation21_spill]]  ;;  %s1670_s19 = scalar_lea.sflag [#allocation5], %s2717_s24 }
 0xa17   : > { %s3141_s5 = sld [smem:[#allocation40_spill]]  ;;  %s2331_s27 = scalar_lea.vmem %s2975_s16, 256 }
 0xa18   : > { %p2332_p3 = scmp.ne.s32.totalorder %s2975_s16, %s2331_s27  ;;  %s2477_s23 = smov [#allocation8]  }
 0xa19   : > { %s2335_s22 = sshll.u32 %s2477_s23, 4  ;;  %s2336_s22 = int_to_ptr.vmem [resolvable:$false] %s2335_s22 }
 0xa1a   : > { %s2337_s11 = scalar_lea.vmem %s2336_s22, 512  ;;  %p2338_p9 = scmp.lt.s32.totalorder %s2975_s16, %s2336_s22 }
 0xa1b   : > { %s1969_s7 = sshll.u32 %s3139_s0, 8  ;;  %p2339_p11 = scmp.lt.s32.totalorder %s2337_s11, %s2331_s27 }
 0xa1c   : > { %p3142_p2 = scmp.ne.s32.totalorder %s3140_s12, 0 }
 0xa1d   : > { %s2972_s4 = scalar_lea.hbm %s3141_s5, %s1969_s7  ;;  %p2340_p4 = por %p2339_p11, %p2338_p9 }
 0xa1e   : > { %p2333_p5 = pnand %p2332_p3, %p3142_p2 }
 0xa20   : > { %p2334_p7 = pneg %p2333_p5 }
 0xa22   : > { %p2341_p8 = pnand %p2340_p4, %p2334_p7 }
 0xa24   : > { %2344 = shalt.err (!%p2341_p8)
}
 0xa25   : > { %s2345_s9 = scalar_lea.hbm %s2972_s4, 256  ;;  %s2349_s13 = scalar_lea.hbm %s3141_s5, 512 }
 0xa26   : > { %p2346_p10 = scmp.ne.s32.totalorder %s2972_s4, %s2345_s9  ;;  %p2350_p1 = scmp.lt.s32.totalorder %s2972_s4, %s3141_s5 }
 0xa27   : > { %p2351_p12 = scmp.lt.s32.totalorder %s2349_s13, %s2345_s9 }
 0xa28   : > { %p2347_p0 = pnand %p2346_p10, %p3142_p2 }
 0xa29   : > { %p2352_p13 = por %p2351_p12, %p2350_p1 }
 0xa2a   : > { %p2348_p6 = pneg %p2347_p0 }
 0xa2c   : > { %p2353_p3 = pnand %p2352_p13, %p2348_p6 }
 0xa2e   : > { %2356 = shalt.err (!%p2353_p3)
}
 0xa2f   : > { %s2478_s25 = smov 128  }
 0xa30   : > { %2088 = dma.vmem_to_hbm [thread:$0]  (%p3142_p2), %s2975_s16, 256, %s2972_s4, %s1670_s19, %s2478_s25, %s2478_s25, %s2474_s8  }
 0xa31 PF: > { %s3143_s1 = sld [smem:[#allocation20_spill]] }
 0xa32   : > { %s3144_s15 = sld [smem:[#allocation14_spill]] }
 0xa33   : > { %s3145_s6 = sld [smem:[#allocation22_spill]] }
 0xa37   : > { %p2102_p5 = scmp.ge.s32.totalorder %s3143_s1, 2 }
 0xa38   : > { %s1698_s26 = sand.u32 1, %s3144_s15  }
 0xa39   : > { %p3146_p7 = scmp.ne.s32.totalorder %s3145_s6, 0  ;;  %s1699_s29 = scalar_lea.sflag [#allocation5], %s1698_s26 }
 0xa3b   : > { %p2098_p9 = pnand %p2102_p5, %p3146_p7 }
 0xa3d   : > { %p2099_p11 = pneg %p2098_p9 }
 0xa3f   : > { %2410 = dma.done.wait (%p2099_p11), %s1699_s29, 256  }
 0xa40   : > { %2412 = vsyncadd (%p2099_p11), %s1699_s29, 4294967040  ;;  %s33_s23 = sadd.s32 1, %s3143_s1   ;;  %s3147_s29 = sld [smem:[#allocation12_spill]] }
 0xa41   : > { %p30_p4 = scmp.ge.s32.totalorder %s33_s23, 6   ;;  %s3148_s30 = sld [smem:[#allocation13_spill]] }
 0xa42   : > { %s3149_s15 = sld [smem:[#allocation25_spill]] }
 0xa43   : > { %s3150_s16 = sld [smem:[#allocation15_spill]] }
 0xa44   : > { %s3151_s17 = sld [smem:[#allocation16_spill]] }
 0xa45   : > { %s3152_s18 = sld [smem:[#allocation26_spill]]  ;;  %32 = sbr.rel (!%p30_p4) target bundleno = 26 (0x1a), region = 178 }
 0xa46   : > { %s3153_s19 = sld [smem:[#allocation18_spill]] }
 0xa47   : > { %s3154_s20 = sld [smem:[#allocation19_spill]] }
 0xa48   : > { %s3155_s21 = sld [smem:[#allocation23_spill]] }
 0xa49   : > { %s3156_s22 = sld [smem:[#allocation24_spill]] }
 0xa4a   :  { %1704 = vsyncpa [#allocation4], 1 }
 0xa4b   :  { %1706 = vsyncpa [#allocation4 + $0x1], 1 }
 0xa4c   :  { %1707 = vsyncpa [#allocation7], 1 }
 0xa4d   :  { %1709 = vsyncpa [#allocation7 + $0x1], 1 }
 0xa4e   :  { %1710 = vsyncpa [#allocation5], 1 }
 0xa4f   :  { %1712 = vsyncpa [#allocation5 + $0x1], 1 }

</bundles_post_ra>
